<compile_context>
chip_gen: v5e
topology: v5e:2x2
jax: 0.10.0
libtpu: 0.0.40
codegen_flags: <defaults>
</compile_context>

<pallas_src>
import functools

import jax
import jax.numpy as jnp
from jax.experimental import pallas as pl
from jax.experimental.pallas import tpu as pltpu

EPS = 1e-5


def bn_add_kernel(x_ref, add_ref, gamma_ref, beta_ref, o_ref, *, c_blk):
    # x_ref, add_ref, o_ref: [N, c_blk, HW]; gamma_ref, beta_ref: [C, 1] (resident)
    x = x_ref[...].astype(jnp.float32)
    n, cb, hw = x.shape
    inv_r = 1.0 / float(n * hw)

    # Single-pass statistics: lane-axis (HW) reduction first, then the small
    # leading-N reduction; normalization folded into one FMA (scale/bias).
    s = jnp.sum(jnp.sum(x, axis=2, keepdims=True), axis=0, keepdims=True)        # [1,cb,1]
    ss = jnp.sum(jnp.sum(x * x, axis=2, keepdims=True), axis=0, keepdims=True)   # [1,cb,1]
    mean = s * inv_r
    # Clamp: E[x^2] - mean^2 can go slightly negative in f32 (cancellation).
    var = jnp.maximum(ss * inv_r - mean * mean, 0.0)   # biased variance (training-mode BN)

    # gamma/beta live as one full (C,1) resident block; slice this tile's channels.
    c0 = pl.multiple_of(pl.program_id(0) * c_blk, c_blk)
    gamma = gamma_ref[pl.ds(c0, c_blk), :].astype(jnp.float32)[None]   # [1, c_blk, 1]
    beta = beta_ref[pl.ds(c0, c_blk), :].astype(jnp.float32)[None]     # [1, c_blk, 1]

    scale = gamma * jax.lax.rsqrt(var + EPS)           # [1, c_blk, 1]
    bias = beta - mean * scale                         # [1, c_blk, 1]

    # Re-read the input tile (already resident in VMEM) instead of reusing the
    # Python value held across the reduction -> keeps vreg pressure / spills low.
    out = x_ref[...].astype(jnp.float32) * scale + (add_ref[...].astype(jnp.float32) + bias)
    o_ref[...] = out.astype(o_ref.dtype)


def _pick_channel_block(n, c, hw, budget_bytes=20 << 20):
    """Largest channel block whose double-buffered x/add/out working set
    (6 * N * c_blk * HW * 4 B) fits the budget, while keeping grid >= 2 so the
    'parallel' channel axis can shard across both v7x TensorCores."""
    for cand in (512, 256, 128, 64, 32, 16, 8):
        if c % cand != 0:
            continue
        if c // cand < 2:
            continue
        if 6 * n * cand * hw * 4 <= budget_bytes:
            return cand
    # Fallback: single block (grid=1) -- only hit for very small / odd C.
    return c


def batchnorm_add(x179, x172, gamma, beta):
    """x179, x172: NCHW float32. Returns BatchNorm2d(x179) + x172 in NCHW."""
    n, c, h, w = x179.shape
    hw = h * w
    # Free reshapes (contiguous); no NCHW<->NHWC transposes outside the kernel.
    x3d = x179.reshape(n, c, hw)
    a3d = x172.reshape(n, c, hw)
    g2d = gamma.reshape(c, 1)
    b2d = beta.reshape(c, 1)

    c_blk = _pick_channel_block(n, c, hw)
    grid = (c // c_blk,)

    kernel = functools.partial(bn_add_kernel, c_blk=c_blk)

    out3d = pl.pallas_call(
        kernel,
        out_shape=jax.ShapeDtypeStruct((n, c, hw), x179.dtype),
        grid=grid,
        in_specs=[
            pl.BlockSpec((n, c_blk, hw), lambda j: (0, j, 0)),
            pl.BlockSpec((n, c_blk, hw), lambda j: (0, j, 0)),
            # gamma/beta: one full resident block, constant index_map -> no
            # per-step re-DMA of the tiny parameter slabs.
            pl.BlockSpec((c, 1), lambda j: (0, 0)),
            pl.BlockSpec((c, 1), lambda j: (0, 0)),
        ],
        out_specs=pl.BlockSpec((n, c_blk, hw), lambda j: (0, j, 0)),
        compiler_params=pltpu.CompilerParams(
            dimension_semantics=("parallel",),
            # 512-channel blocks (~9.6 MiB double-buffered at the production
            # shape) need more than v5e's 16 MiB default scoped VMEM; 32 MiB is
            # safe on v5e/v6e (128 MiB physical) and matches the v7x default.
            vmem_limit_bytes=32 << 20,
        ),
    )(x3d, a3d, g2d, b2d)

    return out3d.reshape(n, c, h, w)


def reference(x179, x172, gamma, beta):
    mean = jnp.mean(x179, axis=(0, 2, 3), keepdims=True)
    var = jnp.mean((x179 - mean) ** 2, axis=(0, 2, 3), keepdims=True)
    y = (x179 - mean) / jnp.sqrt(var + EPS)
    y = y * gamma.reshape(1, -1, 1, 1) + beta.reshape(1, -1, 1, 1)
    return y + x172


if __name__ == "__main__":
    # Small shapes consistent with the module (original: [1, 1024, 28, 28]).
    # H=W=16 keeps the lane axis (HW=256) >= 128 so output stores stay
    # unmasked / lane-dense, same regime as the production HW=784.
    N, C, H, W = 2, 256, 16, 16
    key = jax.random.PRNGKey(0)
    k1, k2, k3, k4 = jax.random.split(key, 4)

    x179 = jax.random.normal(k1, (N, C, H, W), dtype=jnp.float32)
    x172 = jax.random.normal(k2, (N, C, H, W), dtype=jnp.float32)
    # PyTorch init is gamma=1, beta=0; perturb so the affine path is exercised.
    gamma = 1.0 + 0.1 * jax.random.normal(k3, (C,), dtype=jnp.float32)
    beta = 0.1 * jax.random.normal(k4, (C,), dtype=jnp.float32)

    out = batchnorm_add(x179, x172, gamma, beta)
    jax.block_until_ready(out)

    ref = reference(x179, x172, gamma, beta)
    assert out.shape == (N, C, H, W)
    assert jnp.allclose(out, ref, atol=1e-4, rtol=1e-4)

    print("KERNEL_OK")
</pallas_src>

<mosaic_0001>
module attributes {stable_mosaic.version = 11 : i64} {
  func.func @bn_add_kernel(%arg0: i32, %arg1: memref<2x128x256xf32, #tpu.memory_space<vmem>>, %arg2: memref<2x128x256xf32, #tpu.memory_space<vmem>>, %arg3: memref<256x1xf32, #tpu.memory_space<vmem>>, %arg4: memref<256x1xf32, #tpu.memory_space<vmem>>, %arg5: memref<2x128x256xf32, #tpu.memory_space<vmem>>) attributes {dimension_semantics = [#tpu.dimension_semantics<parallel>], iteration_bounds = array<i64: 2>, scalar_prefetch = 0 : i64, scratch_operands = 0 : i64, tpu.core_type = #tpu.core_type<tc>, window_params = [{transform_indices = @transform_0, window_bounds = array<i64: 2, 128, 256>}, {transform_indices = @transform_1, window_bounds = array<i64: 2, 128, 256>}, {pipeline_mode = #tpu.pipeline_mode<synchronous>, transform_indices = @transform_2, window_bounds = array<i64: 256, 1>}, {pipeline_mode = #tpu.pipeline_mode<synchronous>, transform_indices = @transform_3, window_bounds = array<i64: 256, 1>}, {transform_indices = @transform_4, window_bounds = array<i64: 2, 128, 256>}]} {
    %c0 = arith.constant 0 : index
    %c0_0 = arith.constant 0 : index
    %c0_1 = arith.constant 0 : index
    %0 = vector.load %arg1[%c0, %c0_0, %c0_1] : memref<2x128x256xf32, #tpu.memory_space<vmem>>, vector<2x128x256xf32>
    %cst = arith.constant dense<0.000000e+00> : vector<2x128xf32>
    %1 = vector.multi_reduction <add>, %0, %cst [2] : vector<2x128x256xf32> to vector<2x128xf32>
    %2 = vector.shape_cast %1 : vector<2x128xf32> to vector<2x128x1xf32>
    %cst_2 = arith.constant dense<0.000000e+00> : vector<128x1xf32>
    %3 = vector.multi_reduction <add>, %2, %cst_2 [0] : vector<2x128x1xf32> to vector<128x1xf32>
    %4 = vector.shape_cast %3 : vector<128x1xf32> to vector<1x128x1xf32>
    %5 = arith.mulf %0, %0 : vector<2x128x256xf32>
    %cst_3 = arith.constant dense<0.000000e+00> : vector<2x128xf32>
    %6 = vector.multi_reduction <add>, %5, %cst_3 [2] : vector<2x128x256xf32> to vector<2x128xf32>
    %7 = vector.shape_cast %6 : vector<2x128xf32> to vector<2x128x1xf32>
    %cst_4 = arith.constant dense<0.000000e+00> : vector<128x1xf32>
    %8 = vector.multi_reduction <add>, %7, %cst_4 [0] : vector<2x128x1xf32> to vector<128x1xf32>
    %9 = vector.shape_cast %8 : vector<128x1xf32> to vector<1x128x1xf32>
    %cst_5 = arith.constant 0.001953125 : f32
    %10 = vector.broadcast %cst_5 : f32 to vector<1x128x1xf32>
    %11 = arith.mulf %4, %10 : vector<1x128x1xf32>
    %cst_6 = arith.constant 0.001953125 : f32
    %12 = vector.broadcast %cst_6 : f32 to vector<1x128x1xf32>
    %13 = arith.mulf %9, %12 : vector<1x128x1xf32>
    %14 = arith.mulf %11, %11 : vector<1x128x1xf32>
    %15 = arith.subf %13, %14 : vector<1x128x1xf32>
    %cst_7 = arith.constant 0.000000e+00 : f32
    %16 = vector.broadcast %cst_7 : f32 to vector<1x128x1xf32>
    %17 = arith.maximumf %15, %16 : vector<1x128x1xf32>
    %c128_i32 = arith.constant 128 : i32
    %18 = arith.muli %arg0, %c128_i32 : i32
    %19 = tpu.assume_multiple %18, 128 : i32
    %20 = arith.index_cast %19 : i32 to index
    %c0_8 = arith.constant 0 : index
    %21 = vector.load %arg3[%20, %c0_8] : memref<256x1xf32, #tpu.memory_space<vmem>>, vector<128x1xf32>
    %22 = vector.shape_cast %21 : vector<128x1xf32> to vector<1x128x1xf32>
    %23 = arith.index_cast %19 : i32 to index
    %c0_9 = arith.constant 0 : index
    %24 = vector.load %arg4[%23, %c0_9] : memref<256x1xf32, #tpu.memory_space<vmem>>, vector<128x1xf32>
    %25 = vector.shape_cast %24 : vector<128x1xf32> to vector<1x128x1xf32>
    %cst_10 = arith.constant 9.99999974E-6 : f32
    %26 = vector.broadcast %cst_10 : f32 to vector<1x128x1xf32>
    %27 = arith.addf %17, %26 : vector<1x128x1xf32>
    %28 = math.rsqrt %27 : vector<1x128x1xf32>
    %29 = arith.mulf %22, %28 : vector<1x128x1xf32>
    %30 = arith.mulf %11, %29 : vector<1x128x1xf32>
    %31 = arith.subf %25, %30 : vector<1x128x1xf32>
    %c0_11 = arith.constant 0 : index
    %c0_12 = arith.constant 0 : index
    %c0_13 = arith.constant 0 : index
    %32 = vector.load %arg1[%c0_11, %c0_12, %c0_13] : memref<2x128x256xf32, #tpu.memory_space<vmem>>, vector<2x128x256xf32>
    %33 = vector.broadcast %29 : vector<1x128x1xf32> to vector<2x128x256xf32>
    %34 = arith.mulf %32, %33 : vector<2x128x256xf32>
    %c0_14 = arith.constant 0 : index
    %c0_15 = arith.constant 0 : index
    %c0_16 = arith.constant 0 : index
    %35 = vector.load %arg2[%c0_14, %c0_15, %c0_16] : memref<2x128x256xf32, #tpu.memory_space<vmem>>, vector<2x128x256xf32>
    %36 = vector.broadcast %31 : vector<1x128x1xf32> to vector<2x128x256xf32>
    %37 = arith.addf %35, %36 : vector<2x128x256xf32>
    %38 = arith.addf %34, %37 : vector<2x128x256xf32>
    %c0_17 = arith.constant 0 : index
    %c0_18 = arith.constant 0 : index
    %c0_19 = arith.constant 0 : index
    %39 = vector.load %arg5[%c0_17, %c0_18, %c0_19] : memref<2x128x256xf32, #tpu.memory_space<vmem>>, vector<2x128x256xf32>
    tpu.vector_store %arg5[%c0_17, %c0_18, %c0_19], %38 {strides = array<i32>} : memref<2x128x256xf32, #tpu.memory_space<vmem>>, vector<2x128x256xf32>,
    return
  }
  func.func @transform_0(%arg0: i32) -> (i32, i32, i32) {
    %c0_i32 = arith.constant 0 : i32
    %c0_i32_0 = arith.constant 0 : i32
    %c0_i32_1 = arith.constant 0 : i32
    return %c0_i32, %arg0, %c0_i32_0 : i32, i32, i32
  }
  func.func @transform_1(%arg0: i32) -> (i32, i32, i32) {
    %c0_i32 = arith.constant 0 : i32
    %c0_i32_0 = arith.constant 0 : i32
    %c0_i32_1 = arith.constant 0 : i32
    return %c0_i32, %arg0, %c0_i32_0 : i32, i32, i32
  }
  func.func @transform_2(%arg0: i32) -> (i32, i32) {
    %c0_i32 = arith.constant 0 : i32
    %c0_i32_0 = arith.constant 0 : i32
    %c0_i32_1 = arith.constant 0 : i32
    return %c0_i32, %c0_i32_0 : i32, i32
  }
  func.func @transform_3(%arg0: i32) -> (i32, i32) {
    %c0_i32 = arith.constant 0 : i32
    %c0_i32_0 = arith.constant 0 : i32
    %c0_i32_1 = arith.constant 0 : i32
    return %c0_i32, %c0_i32_0 : i32, i32
  }
  func.func @transform_4(%arg0: i32) -> (i32, i32, i32) {
    %c0_i32 = arith.constant 0 : i32
    %c0_i32_0 = arith.constant 0 : i32
    %c0_i32_1 = arith.constant 0 : i32
    return %c0_i32, %arg0, %c0_i32_0 : i32, i32, i32
  }
}

</mosaic_0001>

<bundles_post_ra>
// kernel: tpu_custom_call.1
= control target key start
LH: loop header
LB: loop body
LE: loop exit
PB: predicated region body
PF: predicated region fallthrough
CT: control target
= control target key end

     0   :  { %s3247_s0 = inlined_call_operand.hbm [shape: f32[2,256,256], index: 0, kind: input, shape index: {}]   ;;  %s3248_s1 = inlined_call_operand.hbm [shape: f32[2,256,256], index: 1, kind: input, shape index: {}]   ;;  %s3249_s2 = inlined_call_operand.vmem [shape: f32[256,1], index: 2, kind: input, shape index: {}]   ;;  %s3250_s3 = inlined_call_operand.vmem [shape: f32[256,1], index: 3, kind: input, shape index: {}]   ;;  %s3251_s4 = inlined_call_operand.hbm [shape: f32[2,256,256], index: 4, kind: output, shape index: {}]  }
   0x1   :  { %3260 = sst [smem:[#allocation27_spill]] %s3247_s0 }
   0x2   :  { %9 = vsyncpa [#allocation3], 0 }
   0x3   :  { %11 = vsyncpa [#allocation3 + $0x1], 0 }
   0x4   :  { %12 = vsyncpa [#allocation6], 0 }
   0x5   :  { %14 = vsyncpa [#allocation6 + $0x1], 0 }
   0x6   :  { %15 = vsyncpa [#allocation4], 0 }
   0x7   :  { %17 = vsyncpa [#allocation4 + $0x1], 0  ;;  %s1923_s15 = smov 0   ;;  %s1925_s16 = smov 0  }
   0x8   :  { %s1927_s17 = smov 0   ;;  %s1929_s18 = smov 0  }
   0x9 LB: > { %s1944_s19 = sadd.s32 4294967295, %s1879_s18   ;;  %s1626_s20 = sadd.s32 4294967294, %s1879_s18   ;;  %s1879_s18 = sphi %s1929_s18, %s3295_s18   ;;  %s1875_s17 = sphi %s1927_s17, %s3294_s17   ;;  %s1871_s16 = sphi %s1925_s16, %s3293_s16   ;;  %s1867_s15 = sphi %s1923_s15, %s3292_s15  }
   0xa   : > { %s1948_s21 = sadd.s32 1, %s1879_s18   ;;  %s30_s22 = sadd.s32 1, %s1875_s17 }
   0xb   : > { %s27_s23 = ssub.s32 %s1879_s18, %s1948_s21  ;;  %p37_p0 = scmp.ne.s32.totalorder %s1875_s17, %s1871_s16 }
   0xc   : > { %p28_p1 = scmp.eq.s32.totalorder %s27_s23, 0  ;;  %p38_p2 = scmp.eq.s32.totalorder %s1879_s18, 0 }
   0xd   : > { %p43_p3 = scmp.ne.s32.totalorder %s1871_s16, %s1867_s15  ;;  %p44_p4 = scmp.eq.s32.totalorder %s1944_s19, 0 }
   0xe   : > { %s1960_s24 = scalar_select %p28_p1, %s1875_s17, %s30_s22  }
   0xf   : > { %p1962_p5 = por %p38_p2, %p37_p0  ;;  %p1966_p6 = por %p44_p4, %p43_p3 }
  0x10   : > { %p135_p7 = scmp.eq.s32.totalorder %s1944_s19, 1  ;;  %p141_p8 = scmp.eq.s32.totalorder %s1626_s20, 1 }
  0x11   : > { %p1628_p11 = scmp.ge.s32.totalorder %s1879_s18, 2 }
  0x12   : > { %p1971_p9 = por %p135_p7, %p37_p0  ;;  %p1975_p10 = por %p141_p8, %p43_p3 }
  0x13   : > { %163 = sbr.rel (%p1628_p11) target bundleno = 51 (0x33), region = 24 }
  0x18   : > { %s1983_s29 = sand.u32 1, %s1875_s17   ;;  %s1653_s30 = sshll.u32 %s1879_s18, 8 }
  0x19   : > { %s1629_s5 = sshll.u32 %s1983_s29, 9  ;;  %s3265_s0 = sld [smem:[#allocation27_spill]] }
  0x1a   : > { %s1658_s9 = scalar_select %p1962_p5, [#allocation0], [#allocation14] }
  0x1b   : > { %s171_s11 = scalar_lea.vmem [#allocation2], %s1629_s5  ;;  %s1881_s14 = smov 8192  }
  0x1c   : > { %s192_s12 = sshll.u32 %s171_s11, 4  ;;  %s182_s13 = sld [smem:[%s1658_s9]]   ;;  %s193_s12 = int_to_ptr.vmem [resolvable:$true] %s192_s12 }
  0x1d   : > { %1659 = sst [smem:[#allocation9]] (%p1962_p5), %s1881_s14  ;;  %s1882_s20 = smov 4096  }
  0x1e   : > { %1660 = sst [smem:[#allocation9 + $0x1]] (%p1962_p5), %s1882_s20  ;;  %s1883_s22 = smov 16  }
  0x1f   : > { %s177_s8 = scalar_lea.hbm %s3265_s0, %s1653_s30  ;;  %1661 = sst [smem:[#allocation9 + $0x2]] (%p1962_p5), %s1883_s22 }
  0x20   : > { %s190_s10 = sshll.u32 %s177_s8, 4  ;;  %s1884_s23 = smov 256   ;;  %s191_s10 = int_to_ptr.hbm [resolvable:$true] %s190_s10 }
  0x21   : > { %1662 = sst [smem:[#allocation9 + $0x3]] (%p1962_p5), %s1884_s23  ;;  %s168_s8 = scalar_lea.sflag [#allocation3], %s1983_s29 }
  0x22   : > { %s1633_s6 = sshll.u32 %s182_s13, 26  ;;  %1663 = sst [smem:[#allocation9 + $0x4]] (%p1962_p5), %s1884_s23 }
  0x23   : > { %s1634_s7 = sadd.s32 134217728, %s1633_s6  ;;  %1664 = sst [smem:[#allocation9 + $0x5]] (%p1962_p5), %s1883_s22 }
  0x24   : > { %s1885_s9 = smov [#allocation8]  }
  0x25   : > { %1665 = dma.general (%p1962_p5), %s191_s10, 8192, %s193_s12, %s168_s8, %s1885_s9, [#allocation9], %s1634_s7, 0  }
  0x26   : > { %s225_s20 = scalar_lea.hbm %s3248_s1, %s1653_s30  ;;  %s219_s0 = scalar_lea.vmem [#allocation5], %s1629_s5 }
  0x27   : > { %s240_s13 = sshll.u32 %s219_s0, 4  ;;  %s238_s22 = sshll.u32 %s225_s20, 4  ;;  %s241_s13 = int_to_ptr.vmem [resolvable:$true] %s240_s13  ;;  %s239_s22 = int_to_ptr.hbm [resolvable:$true] %s238_s22 }
  0x28   : > { %s1666_s23 = scalar_select %p1962_p5, [#allocation0], [#allocation15] }
  0x29   : > { %s1886_s10 = smov 8192   ;;  %s1887_s12 = smov 4096  }
  0x2a   : > { %s230_s6 = sld [smem:[%s1666_s23]]   ;;  %s1888_s7 = smov 16  }
  0x2b   : > { %1667 = sst [smem:[#allocation11]] (%p1962_p5), %s1886_s10  ;;  %s1889_s30 = smov 256  }
  0x2c   : > { %1668 = sst [smem:[#allocation11 + $0x1]] (%p1962_p5), %s1887_s12  ;;  %s216_s8 = scalar_lea.sflag [#allocation6], %s1983_s29 }
  0x2d   : > { %1669 = sst [smem:[#allocation11 + $0x2]] (%p1962_p5), %s1888_s7  ;;  %s1890_s9 = smov [#allocation10]  }
  0x2e   : > { %1670 = sst [smem:[#allocation11 + $0x3]] (%p1962_p5), %s1889_s30 }
  0x2f   : > { %1671 = sst [smem:[#allocation11 + $0x4]] (%p1962_p5), %s1889_s30 }
  0x30   : > { %s1639_s0 = sshll.u32 %s230_s6, 26  ;;  %1672 = sst [smem:[#allocation11 + $0x5]] (%p1962_p5), %s1888_s7 }
  0x31   : > { %s1640_s5 = sadd.s32 134217728, %s1639_s0 }
  0x32   : > { %1673 = dma.general (%p1962_p5), %s239_s22, 8192, %s241_s13, %s216_s8, %s1890_s9, [#allocation11], %s1640_s5, 0  }
  0x33 PF: > { %p1641_p12 = scmp.ge.s32.totalorder %s1879_s18, 1  ;;  %p261_p13 = scmp.lt.s32.totalorder %s1879_s18, 3 }
  0x35   : > { %p262_p0 = pnand %p1641_p12, %p261_p13 }
  0x37   : > { %265 = sbr.rel (%p262_p0) target bundleno = 581 (0x245), region = 36 }
  0x3c   : > { %s2030_s11 = sand.u32 1, %s1871_s16  }
  0x3d   : > { %s2033_s14 = sshll.u32 %s2030_s11, 9  ;;  %s268_s29 = scalar_lea.sflag [#allocation3], %s2030_s11 }
  0x3e   : > { %s2037_s20 = scalar_lea.vmem [#allocation2], %s2033_s14 }
  0x3f   : > { %1854 = dma.done.wait (%p1966_p6), %s268_s29, 8192  }
  0x40   : > { %1856 = vsyncadd (%p1966_p6), %s268_s29, 4294959104  ;;  %s278_s25 = scalar_lea.sflag [#allocation6], %s2030_s11  ;;  %s2045_s13 = scalar_lea.vmem [#allocation5], %s2033_s14 }
  0x41   : > { %1858 = dma.done.wait (%p1966_p6), %s278_s25, 8192  }
  0x42   : > { %1860 = vsyncadd (%p1966_p6), %s278_s25, 4294959104  ;;  %v2052_v0 = vld [vmem:[%s2037_s20 + $0x40] sm:$0xff]  ;;  %v2055_v1 = vld [vmem:[%s2037_s20 + $0x48] sm:$0xff]  ;;  %s1645_s26 = sshll.u32 %s1944_s19, 7  ;;  %s2959_s30 = scalar_lea.vmem [#allocation7], %s2033_s14 }
  0x43   : > { %v2058_v2 = vld [vmem:[%s2037_s20 + $0x20] sm:$0xff]  ;;  %v391_v3 = vadd.f32 %v2055_v1, %v2052_v0  ;;  %v2063_v4 = vld [vmem:[%s2037_s20 + $0x28] sm:$0xff]  ;;  %v2076_v9 = vld [vmem:[%s2037_s20 + $0x50] sm:$0xff]  ;;  %s2641_s6 = scalar_lea.vmem %s3249_s2, %s1645_s26  ;;  %s2893_s7 = scalar_lea.vmem %s3250_s3, %s1645_s26 }
  0x44   : > { %v2066_v5 = vld [vmem:[%s2037_s20] sm:$0xff]  ;;  %v2069_v6 = vld [vmem:[%s2037_s20 + $0x8] sm:$0xff]  ;;  %v385_v7 = vadd.f32 %v2063_v4, %v2058_v2  ;;  %v2079_v10 = vld [vmem:[%s2037_s20 + $0x58] sm:$0xff]  ;;  %s1487_s0 = scalar_lea.sflag [#allocation4], %s2030_s11 }
  0x45   : > { %v379_v8 = vadd.f32 %v2069_v6, %v2066_v5  ;;  %392 = vadd.xlane.f32.xlu2 %v391_v3  ;;  %v2082_v11 = vld [vmem:[%s2037_s20 + $0x30] sm:$0xff]  ;;  %v2085_v12 = vld [vmem:[%s2037_s20 + $0x38] sm:$0xff]  ;;  %v394_v15 = vadd.f32 %v2079_v10, %v2076_v9  ;;  %v2100_v18 = vld [vmem:[%s2037_s20 + $0x80] sm:$0xff] }
  0x46   : > { %386 = vadd.xlane.f32.xlu1 %v385_v7  ;;  %v2088_v13 = vld [vmem:[%s2037_s20 + $0x10] sm:$0xff]  ;;  %v2091_v14 = vld [vmem:[%s2037_s20 + $0x18] sm:$0xff]  ;;  %v388_v16 = vadd.f32 %v2085_v12, %v2082_v11  ;;  %v2103_v19 = vld [vmem:[%s2037_s20 + $0x88] sm:$0xff] }
  0x47   : > { %380 = vadd.xlane.f32.xlu0 %v379_v8  ;;  %v382_v17 = vadd.f32 %v2091_v14, %v2088_v13  ;;  %v2106_v20 = vld [vmem:[%s2037_s20 + $0x70] sm:$0xff]  ;;  %v2109_v21 = vld [vmem:[%s2037_s20 + $0x78] sm:$0xff]  ;;  %v2112_v22 = vld [vmem:[%s2037_s20 + $0x60] sm:$0xff]  ;;  %v403_v24 = vadd.f32 %v2103_v19, %v2100_v18 }
  0x48   : > { %v2115_v23 = vld [vmem:[%s2037_s20 + $0x68] sm:$0xff]  ;;  %v400_v25 = vadd.f32 %v2109_v21, %v2106_v20  ;;  %v2124_v27 = vld [vmem:[%s2037_s20 + $0xb0] sm:$0xff]  ;;  %v2127_v28 = vld [vmem:[%s2037_s20 + $0xb8] sm:$0xff] }
  0x49   : > { %v397_v26 = vadd.f32 %v2115_v23, %v2112_v22  ;;  %v2130_v29 = vld [vmem:[%s2037_s20 + $0xa0] sm:$0xff]  ;;  %v2133_v30 = vld [vmem:[%s2037_s20 + $0xa8] sm:$0xff]  ;;  %v2136_v31 = vld [vmem:[%s2037_s20 + $0x90] sm:$0xff]  ;;  %v412_v33 = vadd.f32 %v2127_v28, %v2124_v27 }
  0x4a   : > { %v2139_v32 = vld [vmem:[%s2037_s20 + $0x98] sm:$0xff]  ;;  %v409_v34 = vadd.f32 %v2133_v30, %v2130_v29  ;;  %v2148_v36 = vld [vmem:[%s2037_s20 + $0xe0] sm:$0xff]  ;;  %v2151_v37 = vld [vmem:[%s2037_s20 + $0xe8] sm:$0xff] }
  0x4b   : > { %v406_v35 = vadd.f32 %v2139_v32, %v2136_v31  ;;  %v2154_v38 = vld [vmem:[%s2037_s20 + $0xd0] sm:$0xff]  ;;  %v2157_v39 = vld [vmem:[%s2037_s20 + $0xd8] sm:$0xff]  ;;  %v2160_v40 = vld [vmem:[%s2037_s20 + $0xc0] sm:$0xff]  ;;  %v421_v42 = vadd.f32 %v2151_v37, %v2148_v36 }
  0x4c   : > { %v2163_v41 = vld [vmem:[%s2037_s20 + $0xc8] sm:$0xff]  ;;  %v418_v43 = vadd.f32 %v2157_v39, %v2154_v38  ;;  %v2172_v45 = vld [vmem:[%s2037_s20 + $0x110] sm:$0xff]  ;;  %v2175_v46 = vld [vmem:[%s2037_s20 + $0x118] sm:$0xff] }
  0x4d   : > { %395 = vadd.xlane.f32.xlu2 %v394_v15  ;;  %v415_v44 = vadd.f32 %v2163_v41, %v2160_v40  ;;  %v2178_v47 = vld [vmem:[%s2037_s20 + $0x100] sm:$0xff]  ;;  %v2181_v48 = vld [vmem:[%s2037_s20 + $0x108] sm:$0xff]  ;;  %v2184_v49 = vld [vmem:[%s2037_s20 + $0xf0] sm:$0xff]  ;;  %v430_v51 = vadd.f32 %v2175_v46, %v2172_v45 }
  0x4e   : > { %389 = vadd.xlane.f32.xlu1 %v388_v16  ;;  %v2187_v50 = vld [vmem:[%s2037_s20 + $0xf8] sm:$0xff]  ;;  %v427_v52 = vadd.f32 %v2181_v48, %v2178_v47  ;;  %v2196_v54 = vld [vmem:[%s2037_s20 + $0x140] sm:$0xff]  ;;  %v2199_v55 = vld [vmem:[%s2037_s20 + $0x148] sm:$0xff] }
  0x4f   : > { %383 = vadd.xlane.f32.xlu0 %v382_v17  ;;  %v424_v53 = vadd.f32 %v2187_v50, %v2184_v49  ;;  %v2202_v56 = vld [vmem:[%s2037_s20 + $0x130] sm:$0xff]  ;;  %v2205_v57 = vld [vmem:[%s2037_s20 + $0x138] sm:$0xff]  ;;  %v2208_v58 = vld [vmem:[%s2037_s20 + $0x120] sm:$0xff]  ;;  %v439_v60 = vadd.f32 %v2199_v55, %v2196_v54 }
  0x50   : > { %v2211_v59 = vld [vmem:[%s2037_s20 + $0x128] sm:$0xff]  ;;  %v436_v61 = vadd.f32 %v2205_v57, %v2202_v56  ;;  %v2220_v63 = vld [vmem:[%s2037_s20 + $0x170] sm:$0xff]  ;;  %v2223_v3 = vld [vmem:[%s2037_s20 + $0x178] sm:$0xff] }
  0x51   : > { %v433_v62 = vadd.f32 %v2211_v59, %v2208_v58  ;;  %v2226_v7 = vld [vmem:[%s2037_s20 + $0x160] sm:$0xff]  ;;  %v2229_v8 = vld [vmem:[%s2037_s20 + $0x168] sm:$0xff]  ;;  %v2232_v15 = vld [vmem:[%s2037_s20 + $0x150] sm:$0xff]  ;;  %v448_v17 = vadd.f32 %v2223_v3, %v2220_v63 }
  0x52   : > { %v2235_v16 = vld [vmem:[%s2037_s20 + $0x158] sm:$0xff] }
  0x55   : > { %404 = vadd.xlane.f32.xlu2 %v403_v24  ;;  %v445_v24 = vadd.f32 %v2229_v8, %v2226_v7 }
  0x56   : > { %401 = vadd.xlane.f32.xlu1 %v400_v25  ;;  %v442_v25 = vadd.f32 %v2235_v16, %v2232_v15 }
  0x57   : > { %398 = vadd.xlane.f32.xlu0 %v397_v26  ;;  %v2244_v26 = vld [vmem:[%s2037_s20 + $0x1a0] sm:$0xff] }
  0x5d   : > { %413 = vadd.xlane.f32.xlu2 %v412_v33  ;;  %v2247_v33 = vld [vmem:[%s2037_s20 + $0x1a8] sm:$0xff] }
  0x5e   : > { %410 = vadd.xlane.f32.xlu1 %v409_v34  ;;  %3266 = vst [vmem:[#allocation19_spill] sm:$0xff] %v2247_v33  ;;  %v2250_v34 = vld [vmem:[%s2037_s20 + $0x190] sm:$0xff] }
  0x5f   : > { %407 = vadd.xlane.f32.xlu0 %v406_v35  ;;  %3267 = vst [vmem:[#allocation20_spill] sm:$0xff] %v2250_v34  ;;  %v2253_v35 = vld [vmem:[%s2037_s20 + $0x198] sm:$0xff] }
  0x60   : > { %3268 = vst [vmem:[#allocation21_spill] sm:$0xff] %v2253_v35 }
  0x65   : > { %422 = vadd.xlane.f32.xlu2 %v421_v42  ;;  %v2256_v42 = vld [vmem:[%s2037_s20 + $0x180] sm:$0xff] }
  0x66   : > { %419 = vadd.xlane.f32.xlu1 %v418_v43  ;;  %v2259_v43 = vld [vmem:[%s2037_s20 + $0x188] sm:$0xff] }
  0x67   : > { %416 = vadd.xlane.f32.xlu0 %v415_v44  ;;  %v457_v44 = vadd.f32 %v2247_v33, %v2244_v26  ;;  %v2299_v33 = vld [vmem:[%s2037_s20 + $0x1f8] sm:$0xff] }
  0x68   : > { %3273 = vst [vmem:[#allocation26_spill] sm:$0xff] %v2299_v33 }
  0x6d   : > { %431 = vadd.xlane.f32.xlu2 %v430_v51  ;;  %v454_v51 = vadd.f32 %v2253_v35, %v2250_v34  ;;  %v492_v35 = vmul.f32 %v2069_v6, %v2069_v6  ;;  %v2296_v34 = vld [vmem:[%s2037_s20 + $0x1f0] sm:$0xff]  ;;  %v495_v6 = vmul.f32 %v2058_v2, %v2058_v2 }
  0x6e   : > { %428 = vadd.xlane.f32.xlu1 %v427_v52  ;;  %v451_v52 = vadd.f32 %v2259_v43, %v2256_v42  ;;  %3272 = vst [vmem:[#allocation25_spill] sm:$0xff] %v2296_v34 }
  0x6f   : > { %425 = vadd.xlane.f32.xlu0 %v424_v53  ;;  %v2268_v53 = vld [vmem:[%s2037_s20 + $0x1d0] sm:$0xff] }
  0x70   : > { %3269 = vst [vmem:[#allocation22_spill] sm:$0xff] %v2268_v53 }
  0x75   : > { %440 = vadd.xlane.f32.xlu2 %v439_v60  ;;  %v2271_v60 = vld [vmem:[%s2037_s20 + $0x1d8] sm:$0xff] }
  0x76   : > { %437 = vadd.xlane.f32.xlu1 %v436_v61  ;;  %3270 = vst [vmem:[#allocation23_spill] sm:$0xff] %v2271_v60  ;;  %v2274_v61 = vld [vmem:[%s2037_s20 + $0x1c0] sm:$0xff] }
  0x77   : > { %434 = vadd.xlane.f32.xlu0 %v433_v62  ;;  %v2277_v62 = vld [vmem:[%s2037_s20 + $0x1c8] sm:$0xff] }
  0x78   : > { %3271 = vst [vmem:[#allocation24_spill] sm:$0xff] %v2277_v62 }
  0x7d   : > { %449 = vadd.xlane.f32.xlu2 %v448_v17  ;;  %v2280_v17 = vld [vmem:[%s2037_s20 + $0x1b0] sm:$0xff] }
  0x7e   : > { %446 = vadd.xlane.f32.xlu1 %v445_v24  ;;  %v2283_v24 = vld [vmem:[%s2037_s20 + $0x1b8] sm:$0xff] }
  0x7f   : > { %443 = vadd.xlane.f32.xlu0 %v442_v25  ;;  %v466_v25 = vadd.f32 %v2271_v60, %v2268_v53  ;;  %v2302_v60 = vld [vmem:[%s2037_s20 + $0x1e0] sm:$0xff]  ;;  %v2305_v53 = vld [vmem:[%s2037_s20 + $0x1e8] sm:$0xff] }
  0x85   : > { %458 = vadd.xlane.f32.xlu2 %v457_v44  ;;  %v463_v44 = vadd.f32 %v2277_v62, %v2274_v61 }
  0x86   : > { %455 = vadd.xlane.f32.xlu1 %v454_v51  ;;  %v460_v51 = vadd.f32 %v2283_v24, %v2280_v17 }
  0x87   : > { %452 = vadd.xlane.f32.xlu0 %v451_v52  ;;  %v491_v52 = vmul.f32 %v2066_v5, %v2066_v5  ;;  %v469_v5 = vadd.f32 %v2305_v53, %v2302_v60 }
  0x89   : > { %v555_v62 = vadd.f32 %v492_v35, %v491_v52  ;;  %v496_v35 = vmul.f32 %v2063_v4, %v2063_v4  ;;  %v493_v52 = vmul.f32 %v2088_v13, %v2088_v13  ;;  %v502_v4 = vmul.f32 %v2079_v10, %v2079_v10 }
  0x8a   : > { %v499_v13 = vmul.f32 %v2052_v0, %v2052_v0  ;;  %v508_v0 = vmul.f32 %v2103_v19, %v2103_v19  ;;  %v506_v10 = vmul.f32 %v2109_v21, %v2109_v21  ;;  %v514_v19 = vmul.f32 %v2127_v28, %v2127_v28 }
  0x8b   : > { %v512_v21 = vmul.f32 %v2133_v30, %v2133_v30  ;;  %v520_v28 = vmul.f32 %v2151_v37, %v2151_v37  ;;  %v518_v30 = vmul.f32 %v2157_v39, %v2157_v39  ;;  %v527_v37 = vmul.f32 %v2208_v58, %v2208_v58 }
  0x8c   : > { %v526_v39 = vmul.f32 %v2175_v46, %v2175_v46  ;;  %v533_v46 = vmul.f32 %v2232_v15, %v2232_v15 }
  0x8d   : > { %467 = vadd.xlane.f32.xlu2 %v466_v25  ;;  %v472_v25 = vadd.f32 %v2299_v33, %v2296_v34  ;;  %v561_v34 = vadd.f32 %v496_v35, %v495_v6 }
  0x8e   : > { %464 = vadd.xlane.f32.xlu1 %v463_v44  ;;  %v497_v44 = vmul.f32 %v2082_v11, %v2082_v11  ;;  %v501_v11 = vmul.f32 %v2076_v9, %v2076_v9 }
  0x8f   : > { %461 = vadd.xlane.f32.xlu0 %v460_v51  ;;  %v498_v51 = vmul.f32 %v2085_v12, %v2085_v12  ;;  %v503_v12 = vmul.f32 %v2112_v22, %v2112_v22  ;;  %v507_v22 = vmul.f32 %v2100_v18, %v2100_v18 }
  0x91   : > { %v564_v33 = vadd.f32 %v498_v51, %v497_v44  ;;  %v579_v44 = vadd.f32 %v508_v0, %v507_v22  ;;  %v516_v51 = vmul.f32 %v2163_v41, %v2163_v41  ;;  %v521_v41 = vmul.f32 %v2184_v49, %v2184_v49 }
  0x92   : > { %v529_v22 = vmul.f32 %v2202_v56, %v2202_v56  ;;  %v540_v56 = vmul.f32 %v2259_v43, %v2259_v43  ;;  %v543_v43 = vmul.f32 %v2244_v26, %v2244_v26 }
  0x95   : > { %556 = vadd.xlane.f32.xlu2 %v555_v62  ;;  %v494_v62 = vmul.f32 %v2091_v14, %v2091_v14  ;;  %v500_v14 = vmul.f32 %v2055_v1, %v2055_v1  ;;  %v505_v1 = vmul.f32 %v2106_v20, %v2106_v20  ;;  %v511_v20 = vmul.f32 %v2130_v29, %v2130_v29 }
  0x96   : > { %473 = vadd.xlane.f32.xlu1 %v472_v25  ;;  %v504_v25 = vmul.f32 %v2115_v23, %v2115_v23  ;;  %v509_v23 = vmul.f32 %v2136_v31, %v2136_v31  ;;  %v513_v31 = vmul.f32 %v2124_v27, %v2124_v27  ;;  %v517_v29 = vmul.f32 %v2154_v38, %v2154_v38 }
  0x97   : > { %470 = vadd.xlane.f32.xlu0 %v469_v5  ;;  %v558_v2 = vadd.f32 %v494_v62, %v493_v52  ;;  %v570_v5 = vadd.f32 %v502_v4, %v501_v11  ;;  %v567_v9 = vadd.f32 %v500_v14, %v499_v13  ;;  %v576_v18 = vadd.f32 %v506_v10, %v505_v1 }
  0x98   : > { %v588_v52 = vadd.f32 %v514_v19, %v513_v31  ;;  %v585_v27 = vadd.f32 %v512_v21, %v511_v20  ;;  %v522_v62 = vmul.f32 %v2187_v50, %v2187_v50  ;;  %v594_v50 = vadd.f32 %v518_v30, %v517_v29  ;;  %v3275_v20 = vld [vmem:[#allocation20_spill] sm:$0xff] }
  0x99   : > { %v528_v38 = vmul.f32 %v2211_v59, %v2211_v59  ;;  %v523_v4 = vmul.f32 %v2178_v47, %v2178_v47  ;;  %v524_v13 = vmul.f32 %v2181_v48, %v2181_v48  ;;  %v531_v59 = vmul.f32 %v2196_v54, %v2196_v54 }
  0x9a   : > { %v600_v49 = vadd.f32 %v522_v62, %v521_v41  ;;  %v534_v47 = vmul.f32 %v2235_v16, %v2235_v16  ;;  %v532_v48 = vmul.f32 %v2199_v55, %v2199_v55  ;;  %v537_v10 = vmul.f32 %v2220_v63, %v2220_v63 }
  0x9b   : > { %v609_v58 = vadd.f32 %v528_v38, %v527_v37  ;;  %v539_v55 = vmul.f32 %v2256_v42, %v2256_v42  ;;  %v541_v21 = vmul.f32 %v3275_v20, %v3275_v20  ;;  %v551_v29 = vmul.f32 %v2302_v60, %v2302_v60 }
  0x9c   : > { %v618_v15 = vadd.f32 %v534_v47, %v533_v46  ;;  %v615_v1 = vadd.f32 %v532_v48, %v531_v59  ;;  %v552_v30 = vmul.f32 %v2305_v53, %v2305_v53  ;;  %v3281_v46 = vld [vmem:[#allocation26_spill] sm:$0xff] }
  0x9d   : > { %565 = vadd.xlane.f32.xlu2 %v564_v33  ;;  %v573_v33 = vadd.f32 %v504_v25, %v503_v12  ;;  %v525_v25 = vmul.f32 %v2172_v45, %v2172_v45 }
  0x9e   : > { %562 = vadd.xlane.f32.xlu1 %v561_v34  ;;  %v510_v34 = vmul.f32 %v2139_v32, %v2139_v32  ;;  %v515_v32 = vmul.f32 %v2160_v40, %v2160_v40  ;;  %v519_v40 = vmul.f32 %v2148_v36, %v2148_v36 }
  0x9f   : > { %559 = vadd.xlane.f32.xlu0 %v558_v2 }
  0xa0   : > { %v582_v6 = vadd.f32 %v510_v34, %v509_v23  ;;  %v591_v35 = vadd.f32 %v516_v51, %v515_v32  ;;  %v597_v12 = vadd.f32 %v520_v28, %v519_v40  ;;  %v530_v23 = vmul.f32 %v2205_v57, %v2205_v57  ;;  %v3277_v28 = vld [vmem:[#allocation22_spill] sm:$0xff] }
  0xa1   : > { %v538_v57 = vmul.f32 %v2223_v3, %v2223_v3  ;;  %v627_v32 = vadd.f32 %v540_v56, %v539_v55  ;;  %v545_v3 = vmul.f32 %v2280_v17, %v2280_v17 }
  0xa2   : > { %v612_v16 = vadd.f32 %v530_v23, %v529_v22 }
  0xa3   : > { %v624_v42 = vadd.f32 %v538_v57, %v537_v10 }
  0xa5   : > { %574 = vadd.xlane.f32.xlu2 %v573_v33 }
  0xa6   : > { %571 = vadd.xlane.f32.xlu1 %v570_v5  ;;  %v606_v5 = vadd.f32 %v526_v39, %v525_v25  ;;  %v3279_v25 = vld [vmem:[#allocation24_spill] sm:$0xff] }
  0xa7   : > { %568 = vadd.xlane.f32.xlu0 %v567_v9  ;;  %v603_v9 = vadd.f32 %v524_v13, %v523_v4  ;;  %v548_v37 = vmul.f32 %v3279_v25, %v3279_v25 }
  0xad   : > { %583 = vadd.xlane.f32.xlu2 %v582_v6  ;;  %v535_v6 = vmul.f32 %v2226_v7, %v2226_v7  ;;  %v546_v7 = vmul.f32 %v2283_v24, %v2283_v24  ;;  %v549_v24 = vmul.f32 %v3277_v28, %v3277_v28 }
  0xae   : > { %580 = vadd.xlane.f32.xlu1 %v579_v44  ;;  %v536_v44 = vmul.f32 %v2229_v8, %v2229_v8  ;;  %v3274_v8 = vld [vmem:[#allocation19_spill] sm:$0xff] }
  0xaf   : > { %577 = vadd.xlane.f32.xlu0 %v576_v18  ;;  %v544_v19 = vmul.f32 %v3274_v8, %v3274_v8  ;;  %v636_v41 = vadd.f32 %v546_v7, %v545_v3 }
  0xb0   : > { %v621_v51 = vadd.f32 %v536_v44, %v535_v6 }
  0xb1   : > { %v633_v62 = vadd.f32 %v544_v19, %v543_v43 }
  0xb5   : > { %592 = vadd.xlane.f32.xlu2 %v591_v35  ;;  %v3276_v35 = vld [vmem:[#allocation21_spill] sm:$0xff] }
  0xb6   : > { %589 = vadd.xlane.f32.xlu1 %v588_v52  ;;  %v542_v52 = vmul.f32 %v3276_v35, %v3276_v35 }
  0xb7   : > { %586 = vadd.xlane.f32.xlu0 %v585_v27 }
  0xb8   : > { %v2371_v2 = vpop.xlane.xlu2 %392  ;;  %v630_v17 = vadd.f32 %v542_v52, %v541_v21 }
  0xb9   : > { %v2373_v36 = vpop.xlane.xlu1 %386 }
  0xba   : > { %v2375_v11 = vpop.xlane.xlu0 %380 }
  0xbd   : > { %601 = vadd.xlane.f32.xlu2 %v600_v49  ;;  %v3278_v49 = vld [vmem:[#allocation23_spill] sm:$0xff] }
  0xbe   : > { %598 = vadd.xlane.f32.xlu1 %v597_v12  ;;  %v550_v12 = vmul.f32 %v3278_v49, %v3278_v49 }
  0xbf   : > { %595 = vadd.xlane.f32.xlu0 %v594_v50  ;;  %v547_v50 = vmul.f32 %v2274_v61, %v2274_v61  ;;  %v554_v61 = vmul.f32 %v3281_v46, %v3281_v46 }
  0xc0   : > { %v2389_v14 = vpop.xlane.xlu2 %395 }
  0xc1   : > { %v2391_v45 = vpop.xlane.xlu1 %389  ;;  %v639_v53 = vadd.f32 %v548_v37, %v547_v50  ;;  %v1891_v50 = vmov 0  }
  0xc2   : > { %v384_v33 = vpop.xlane.xlu0 %383  ;;  %1740 = vset.pattern.permute.xlu0 %v1891_v50  ;;  %1739 = vset.pattern.permute.xlu2 %v1891_v50 }
  0xc3   : > { %1738 = vset.pattern.permute.xlu1 %v1891_v50 }
  0xc5   : > { %610 = vadd.xlane.f32.xlu2 %v609_v58  ;;  %v645_v58 = vadd.f32 %v552_v30, %v551_v29 }
  0xc6   : > { %607 = vadd.xlane.f32.xlu1 %v606_v5  ;;  %v642_v5 = vadd.f32 %v550_v12, %v549_v24 }
  0xc7   : > { %604 = vadd.xlane.f32.xlu0 %v603_v9  ;;  %v3280_v9 = vld [vmem:[#allocation25_spill] sm:$0xff] }
  0xc8   : > { %v2405_v34 = vpop.xlane.xlu2 %404  ;;  %v553_v59 = vmul.f32 %v3280_v9, %v3280_v9 }
  0xc9   : > { %v2407_v54 = vpop.xlane.xlu1 %401 }
  0xca   : > { %v2409_v0 = vpop.xlane.xlu0 %398 }
  0xcd   : > { %619 = vadd.xlane.f32.xlu2 %v618_v15  ;;  %v648_v15 = vadd.f32 %v554_v61, %v553_v59 }
  0xce   : > { %616 = vadd.xlane.f32.xlu1 %v615_v1 }
  0xcf   : > { %613 = vadd.xlane.f32.xlu0 %v612_v16 }
  0xd0   : > { %v2423_v18 = vpop.xlane.xlu2 %413 }
  0xd1   : > { %v411_v63 = vpop.xlane.xlu1 %410 }
  0xd2   : > { %v408_v31 = vpop.xlane.xlu0 %407 }
  0xd5   : > { %628 = vadd.xlane.f32.xlu2 %v627_v32 }
  0xd6   : > { %625 = vadd.xlane.f32.xlu1 %v624_v42 }
  0xd7   : > { %622 = vadd.xlane.f32.xlu0 %v621_v51 }
  0xd8   : > { %v423_v27 = vpop.xlane.xlu2 %422 }
  0xd9   : > { %v420_v40 = vpop.xlane.xlu1 %419 }
  0xda   : > { %v417_v26 = vpop.xlane.xlu0 %416 }
  0xdd   : > { %637 = vadd.xlane.f32.xlu2 %v636_v41 }
  0xde   : > { %634 = vadd.xlane.f32.xlu1 %v633_v62 }
  0xdf   : > { %631 = vadd.xlane.f32.xlu0 %v630_v17 }
  0xe0   : > { %v432_v38 = vpop.xlane.xlu2 %431 }
  0xe1   : > { %v476_v39 = vadd.f32 %v432_v38, %v384_v33  ;;  %v429_v4 = vpop.xlane.xlu1 %428 }
  0xe2   : > { %v426_v13 = vpop.xlane.xlu0 %425  ;;  %v475_v60 = vadd.f32 %v429_v4, %v2375_v11 }
  0xe3   : > { %v2494_v29 = vmul.f32 0.001953125, %v476_v39 }
  0xe4   : > { %v2498_v49 = vmul.f32 0.001953125, %v475_v60 }
  0xe5   : > { %646 = vadd.xlane.f32.xlu2 %v645_v58  ;;  %v700_v39 = vmul.f32 %v2494_v29, %v2494_v29 }
  0xe6   : > { %643 = vadd.xlane.f32.xlu1 %v642_v5  ;;  %v699_v9 = vmul.f32 %v2498_v49, %v2498_v49 }
  0xe7   : > { %640 = vadd.xlane.f32.xlu0 %v639_v53 }
  0xe8   : > { %v441_v47 = vpop.xlane.xlu2 %440 }
  0xe9   : > { %v479_v48 = vadd.f32 %v441_v47, %v2371_v2  ;;  %v438_v33 = vpop.xlane.xlu1 %437 }
  0xea   : > { %v435_v22 = vpop.xlane.xlu0 %434  ;;  %v478_v23 = vadd.f32 %v438_v33, %v2391_v45 }
  0xeb   : > { %v477_v11 = vadd.f32 %v435_v22, %v2373_v36  ;;  %v2500_v4 = vmul.f32 0.001953125, %v479_v48 }
  0xec   : > { %v2504_v5 = vmul.f32 0.001953125, %v478_v23 }
  0xed   : > { %v2496_v30 = vmul.f32 0.001953125, %v477_v11  ;;  %v703_v48 = vmul.f32 %v2500_v4, %v2500_v4 }
  0xee   : > { %v702_v23 = vmul.f32 %v2504_v5, %v2504_v5 }
  0xef   : > { %649 = vadd.xlane.f32.xlu0 %v648_v15  ;;  %v701_v60 = vmul.f32 %v2496_v30, %v2496_v30 }
  0xf0   : > { %v450_v1 = vpop.xlane.xlu2 %449 }
  0xf1   : > { %v2458_v16 = vadd.f32 %v450_v1, %v2407_v54  ;;  %v447_v10 = vpop.xlane.xlu1 %446 }
  0xf2   : > { %v444_v55 = vpop.xlane.xlu0 %443  ;;  %v481_v56 = vadd.f32 %v447_v10, %v2409_v0 }
  0xf3   : > { %v480_v57 = vadd.f32 %v444_v55, %v2389_v14  ;;  %v2517_v11 = vmul.f32 0.001953125, %v2458_v16 }
  0xf4   : > { %v2519_v15 = vmul.f32 0.001953125, %v481_v56 }
  0xf5   : > { %v2510_v59 = vmul.f32 0.001953125, %v480_v57 }
  0xf7   : > { %v704_v10 = vmul.f32 %v2510_v59, %v2510_v59 }
  0xf8   : > { %v459_v6 = vpop.xlane.xlu2 %458 }
  0xf9   : > { %v485_v2 = vadd.f32 %v459_v6, %v411_v63  ;;  %v456_v44 = vpop.xlane.xlu1 %455 }
  0xfa   : > { %v453_v32 = vpop.xlane.xlu0 %452  ;;  %v484_v42 = vadd.f32 %v456_v44, %v408_v31 }
  0xfb   : > { %v483_v45 = vadd.f32 %v453_v32, %v2405_v34  ;;  %v2523_v55 = vmul.f32 0.001953125, %v485_v2 }
  0xfc   : > { %v2525_v32 = vmul.f32 0.001953125, %v484_v42 }
 0x100   : > { %v468_v36 = vpop.xlane.xlu2 %467 }
 0x101   : > { %v2463_v51 = vadd.f32 %v468_v36, %v420_v40  ;;  %v465_v43 = vpop.xlane.xlu1 %464  ;;  %v2527_v36 = vmul.f32 0.001953125, %v483_v45 }
 0x102   : > { %v462_v3 = vpop.xlane.xlu0 %461  ;;  %v2465_v54 = vadd.f32 %v465_v43, %v417_v26 }
 0x103   : > { %v2468_v7 = vadd.f32 %v462_v3, %v2423_v18  ;;  %v2536_v2 = vmul.f32 0.001953125, %v2463_v51 }
 0x105   : > { %v2543_v45 = vmul.f32 0.001953125, %v2468_v7 }
 0x108   : > { %v557_v0 = vpop.xlane.xlu2 %556 }
 0x109   : > { %v474_v8 = vpop.xlane.xlu1 %473 }
 0x10a   : > { %v471_v14 = vpop.xlane.xlu0 %470  ;;  %v2470_v19 = vadd.f32 %v474_v8, %v426_v13 }
 0x10b   : > { %v2472_v63 = vadd.f32 %v471_v14, %v423_v27 }
 0x110   : > { %v566_v31 = vpop.xlane.xlu2 %565 }
 0x111   : > { %v563_v20 = vpop.xlane.xlu1 %562 }
 0x112   : > { %v560_v34 = vpop.xlane.xlu0 %559 }
 0x118   : > { %v2474_v21 = vpop.xlane.xlu2 %574 }
 0x119   : > { %v572_v35 = vpop.xlane.xlu1 %571 }
 0x11a   : > { %v569_v52 = vpop.xlane.xlu0 %568 }
 0x120   : > { %v2476_v40 = vpop.xlane.xlu2 %583 }
 0x121   : > { %v2478_v26 = vpop.xlane.xlu1 %580 }
 0x122   : > { %v2480_v18 = vpop.xlane.xlu0 %577 }
 0x128   : > { %v2482_v41 = vpop.xlane.xlu2 %592 }
 0x129   : > { %v2484_v62 = vpop.xlane.xlu1 %589 }
 0x12a   : > { %v2486_v17 = vpop.xlane.xlu0 %586 }
 0x130   : > { %v2488_v27 = vpop.xlane.xlu2 %601 }
 0x131   : > { %v2490_v28 = vpop.xlane.xlu1 %598 }
 0x132   : > { %v2492_v24 = vpop.xlane.xlu0 %595 }
 0x138   : > { %v611_v12 = vpop.xlane.xlu2 %610 }
 0x139   : > { %v608_v25 = vpop.xlane.xlu1 %607  ;;  %v653_v37 = vadd.f32 %v611_v12, %v563_v20 }
 0x13a   : > { %v605_v38 = vpop.xlane.xlu0 %604  ;;  %v652_v13 = vadd.f32 %v608_v25, %v560_v34  ;;  %v2539_v34 = vmul.f32 0.001953125, %v2465_v54  ;;  %v705_v54 = vmul.f32 %v2519_v15, %v2519_v15  ;;  %v2557_v25 = vmul.f32 %v2525_v32, %v2525_v32 }
 0x13b   : > { %v651_v58 = vadd.f32 %v605_v38, %v557_v0  ;;  %v685_v53 = vmul.f32 0.001953125, %v653_v37  ;;  %v707_v37 = vmul.f32 %v2527_v36, %v2527_v36  ;;  %v2563_v38 = vmul.f32 %v2536_v2, %v2536_v2 }
 0x13c   : > { %v684_v46 = vmul.f32 0.001953125, %v652_v13 }
 0x13d   : > { %v683_v61 = vmul.f32 0.001953125, %v651_v58  ;;  %v717_v47 = vsub.f32 %v685_v53, %v701_v60  ;;  %v2567_v58 = vmul.f32 %v2539_v34, %v2539_v34 }
 0x13e   : > { %v716_v33 = vsub.f32 %v684_v46, %v700_v39  ;;  %v2571_v39 = vmul.f32 %v2543_v45, %v2543_v45 }
 0x13f   : > { %v715_v22 = vsub.f32 %v683_v61, %v699_v9  ;;  %v733_v1 = vmax.f32 %v717_v47, 0.0  ;;  %v2576_v61 = vmul.f32 0.001953125, %v2470_v19  ;;  %v2579_v47 = vmul.f32 0.001953125, %v2472_v63 }
 0x140   : > { %v732_v57 = vmax.f32 %v716_v33, 0.0  ;;  %v620_v44 = vpop.xlane.xlu2 %619 }
 0x141   : > { %v731_v6 = vmax.f32 %v715_v22, 0.0  ;;  %v2529_v43 = vadd.f32 1e-05, %v733_v1  ;;  %v617_v3 = vpop.xlane.xlu1 %616  ;;  %v656_v16 = vadd.f32 %v620_v44, %v572_v35 }
 0x142   : > { %v614_v0 = vpop.xlane.xlu0 %613  ;;  %v2531_v56 = vadd.f32 1e-05, %v732_v57  ;;  %v655_v14 = vadd.f32 %v617_v3, %v569_v52  ;;  %v706_v52 = vmul.f32 %v2517_v11, %v2517_v11 }
 0x143   : > { %v2533_v8 = vadd.f32 1e-05, %v731_v6  ;;  %v654_v20 = vadd.f32 %v614_v0, %v566_v31  ;;  %1741 = vrsqrt.f32 %v2529_v43  ;;  %v688_v42 = vmul.f32 0.001953125, %v656_v16 }
 0x144   : > { %1743 = vrsqrt.f32 %v2531_v56  ;;  %v687_v35 = vmul.f32 0.001953125, %v655_v14  ;;  %v2553_v31 = vmul.f32 %v2523_v55, %v2523_v55  ;;  %vm824_vm0 = vweird.f32 %v2529_v43 }
 0x145   : > { %v686_v12 = vmul.f32 0.001953125, %v654_v20  ;;  %1745 = vrsqrt.f32 %v2533_v8  ;;  %v720_v51 = vsub.f32 %v688_v42, %v704_v10  ;;  %vm814_vm1 = vweird.f32 %v2531_v56 }
 0x146   : > { %v719_v50 = vsub.f32 %v687_v35, %v703_v48  ;;  %v2607_v35 = vmul.f32 %v2576_v61, %v2576_v61  ;;  %vm804_vm4 = vweird.f32 %v2533_v8 }
 0x147   : > { %v718_v7 = vsub.f32 %v686_v12, %v702_v23  ;;  %v736_v13 = vmax.f32 %v720_v51, 0.0 }
 0x148   : > { %v735_v60 = vmax.f32 %v719_v50, 0.0  ;;  %v629_v9 = vpop.xlane.xlu2 %628 }
 0x149   : > { %v734_v53 = vmax.f32 %v718_v7, 0.0  ;;  %v2573_v46 = vpop.eup %1741  ;;  %v2581_v48 = vadd.f32 1e-05, %v736_v13  ;;  %v626_v33 = vpop.xlane.xlu1 %625  ;;  %v659_v22 = vadd.f32 %v629_v9, %v2478_v26 }
 0x14a   : > { %v623_v23 = vpop.xlane.xlu0 %622  ;;  %v2584_v1 = vpop.eup %1743  ;;  %v819_v10 = vmul.f32 %v2573_v46, %v2529_v43  ;;  %v2588_v57 = vadd.f32 1e-05, %v735_v60  ;;  %v658_v19 = vadd.f32 %v626_v33, %v2480_v18  ;;  %vm825_vm2 = vweird.f32 %v2573_v46 }
 0x14b   : > { %v2590_v6 = vadd.f32 1e-05, %v734_v53  ;;  %v2593_v44 = vpop.eup %1745  ;;  %v809_v63 = vmul.f32 %v2584_v1, %v2531_v56  ;;  %1747 = vrsqrt.f32 %v2581_v48  ;;  %v691_v26 = vmul.f32 0.001953125, %v659_v22  ;;  %vm826_vm6 = vmor %vm824_vm0, %vm825_vm2 }
 0x14c   : > { %v657_v3 = vadd.f32 %v623_v23, %v2474_v21  ;;  %v820_v16 = vmul.f32 %v2573_v46, %v819_v10  ;;  %v799_v0 = vmul.f32 %v2593_v44, %v2533_v8  ;;  %1749 = vrsqrt.f32 %v2588_v57 }
 0x14d   : > { %v690_v14 = vmul.f32 0.001953125, %v658_v19  ;;  %v810_v18 = vmul.f32 %v2584_v1, %v809_v63  ;;  %1751 = vrsqrt.f32 %v2590_v6  ;;  %v723_v20 = vsub.f32 %v691_v26, %v707_v37 }
 0x14e   : > { %v689_v42 = vmul.f32 0.001953125, %v657_v3  ;;  %v821_v21 = vmul.f32 0.5, %v820_v16  ;;  %v800_v50 = vmul.f32 %v2593_v44, %v799_v0  ;;  %vm815_vm3 = vweird.f32 %v2584_v1 }
 0x14f   : > { %v722_v12 = vsub.f32 %v690_v14, %v706_v52  ;;  %v811_v51 = vmul.f32 0.5, %v810_v18  ;;  %v739_v7 = vmax.f32 %v723_v20, 0.0  ;;  %vm805_vm5 = vweird.f32 %v2593_v44  ;;  %vm816_vm7 = vmor %vm814_vm1, %vm815_vm3 }
 0x150   : > { %v721_v13 = vsub.f32 %v689_v42, %v705_v54  ;;  %v638_v53 = vpop.xlane.xlu2 %637  ;;  %v822_v37 = vsub.f32 1.5, %v821_v21  ;;  %vm806_vm8 = vmor %vm804_vm4, %vm805_vm5  ;;  %vm844_vm10 = vweird.f32 %v2588_v57  ;;  %vm834_vm13 = vweird.f32 %v2590_v6 }
 0x151   : > { %v738_v60 = vmax.f32 %v722_v12, 0.0  ;;  %v2615_v9 = vpop.eup %1747  ;;  %v2617_v52 = vadd.f32 1e-05, %v739_v7  ;;  %v635_v22 = vpop.xlane.xlu1 %634  ;;  %v662_v23 = vadd.f32 %v638_v53, %v2484_v62  ;;  %v812_v10 = vsub.f32 1.5, %v811_v51 }
 0x152   : > { %v737_v33 = vmax.f32 %v721_v13, 0.0  ;;  %v632_v54 = vpop.xlane.xlu0 %631  ;;  %v2620_v19 = vpop.eup %1749  ;;  %v849_v63 = vmul.f32 %v2615_v9, %v2581_v48  ;;  %v661_v3 = vadd.f32 %v635_v22, %v2486_v17  ;;  %v751_v13 = vld [vmem:[%s2641_s6 + $0x10] sm:$0xff]  ;;  %vm854_vm15 = vweird.f32 %v2581_v48 }
 0x153   : > { %v2624_v26 = vadd.f32 1e-05, %v738_v60  ;;  %v660_v16 = vadd.f32 %v632_v54, %v2476_v40  ;;  %v2629_v0 = vpop.eup %1751  ;;  %v839_v62 = vmul.f32 %v2620_v19, %v2588_v57  ;;  %1753 = vrsqrt.f32 %v2617_v52 }
 0x154   : > { %v2634_v14 = vadd.f32 1e-05, %v737_v33  ;;  %v694_v18 = vmul.f32 0.001953125, %v662_v23  ;;  %v801_v40 = vmul.f32 0.5, %v800_v50  ;;  %v829_v17 = vmul.f32 %v2629_v0, %v2590_v6 }
 0x155   : > { %1755 = vrsqrt.f32 %v2624_v26  ;;  %v693_v20 = vmul.f32 0.001953125, %v661_v3  ;;  %v840_v42 = vmul.f32 %v2620_v19, %v839_v62  ;;  %v692_v12 = vmul.f32 0.001953125, %v660_v16 }
 0x156   : > { %1757 = vrsqrt.f32 %v2634_v14  ;;  %v726_v21 = vsub.f32 %v694_v18, %v2571_v39  ;;  %v850_v51 = vmul.f32 %v2615_v9, %v849_v63  ;;  %v823_v50 = vmul.f32 %v2573_v46, %v822_v37  ;;  %v750_v39 = vld [vmem:[%s2641_s6 + $0x8] sm:$0xff] }
 0x157   : > { %v725_v7 = vsub.f32 %v693_v20, %v2553_v31  ;;  %v830_v60 = vmul.f32 %v2629_v0, %v829_v17  ;;  %v724_v33 = vsub.f32 %v692_v12, %v2557_v25  ;;  %v813_v22 = vmul.f32 %v2584_v1, %v812_v10 }
 0x158   : > { %v742_v53 = vmax.f32 %v726_v21, 0.0  ;;  %v841_v31 = vmul.f32 0.5, %v840_v42  ;;  %v827_v37 = vsel %vm826_vm6, %v2573_v46, %v823_v50  ;;  %v802_v54 = vsub.f32 1.5, %v801_v40  ;;  %v749_v40 = vld [vmem:[%s2641_s6] sm:$0xff] }
 0x159   : > { %v741_v23 = vmax.f32 %v725_v7, 0.0  ;;  %v2667_v25 = vpop.eup %1753  ;;  %v740_v43 = vmax.f32 %v724_v33, 0.0  ;;  %v2671_v3 = vmul.f32 %v827_v37, %v751_v13  ;;  %v817_v10 = vsel %vm816_vm7, %v2584_v1, %v813_v22  ;;  %v644_v16 = vpop.xlane.xlu1 %643 }
 0x15a   : > { %v2669_v63 = vadd.f32 1e-05, %v742_v53  ;;  %v879_v46 = vmul.f32 %v2667_v25, %v2617_v52  ;;  %v2680_v56 = vmul.f32 %v817_v10, %v750_v39  ;;  %v803_v17 = vmul.f32 %v2593_v44, %v802_v54  ;;  %v641_v20 = vpop.xlane.xlu0 %640  ;;  %v647_v7 = vpop.xlane.xlu2 %646 }
 0x15b   : > { %v2674_v62 = vpop.eup %1755  ;;  %v2678_v18 = vadd.f32 1e-05, %v741_v23  ;;  %v2689_v1 = vadd.f32 1e-05, %v740_v43  ;;  %1018 = vperm.xlu0 %1740, %v2671_v3   ;;  %v664_v12 = vadd.f32 %v644_v16, %v2492_v24  ;;  %v831_v13 = vmul.f32 0.5, %v830_v60 }
 0x15c   : > { %v2684_v42 = vpop.eup %1757  ;;  %v869_v21 = vmul.f32 %v2674_v62, %v2624_v26  ;;  %1759 = vrsqrt.f32 %v2669_v63  ;;  %1013 = vperm.xlu2 %1739, %v2680_v56   ;;  %v807_v53 = vsel %vm806_vm8, %v2593_v44, %v803_v17  ;;  %v713_v24 = vmul.f32 %v2579_v47, %v2579_v47 }
 0x15d   : > { %v859_v50 = vmul.f32 %v2684_v42, %v2634_v14  ;;  %1761 = vrsqrt.f32 %v2678_v18  ;;  %v2704_v39 = vmul.f32 %v807_v53, %v749_v40  ;;  %v696_v8 = vmul.f32 0.001953125, %v664_v12 }
 0x15e   : > { %v870_v33 = vmul.f32 %v2674_v62, %v869_v21  ;;  %1763 = vrsqrt.f32 %v2689_v1  ;;  %v851_v60 = vmul.f32 0.5, %v850_v51  ;;  %v665_v22 = vadd.f32 %v647_v7, %v2490_v28  ;;  %v753_v21 = vld [vmem:[%s2641_s6 + $0x20] sm:$0xff] }
 0x15f   : > { %v663_v23 = vadd.f32 %v641_v20, %v2482_v41  ;;  %v880_v37 = vmul.f32 %v2667_v25, %v879_v46  ;;  %v860_v54 = vmul.f32 %v2684_v42, %v859_v50  ;;  %1008 = vperm.xlu1 %1738, %v2704_v39   ;;  %v728_v44 = vsub.f32 %v696_v8, %v2563_v38 }
 0x160   : > { %v842_v43 = vsub.f32 1.5, %v841_v31  ;;  %v2714_v10 = vmul.f32 0.5, %v870_v33  ;;  %v697_v16 = vmul.f32 0.001953125, %v665_v22  ;;  %vm845_vm9 = vweird.f32 %v2620_v19 }
 0x161   : > { %v695_v40 = vmul.f32 0.001953125, %v663_v23  ;;  %v744_v28 = vmax.f32 %v728_v44, 0.0  ;;  %v832_v46 = vsub.f32 1.5, %v831_v13  ;;  %vm2727_vm11 = vmor %vm844_vm10, %vm845_vm9  ;;  %vm835_vm12 = vweird.f32 %v2629_v0 }
 0x162   : > { %v2717_v51 = vpop.eup %1759  ;;  %v843_v41 = vmul.f32 %v2620_v19, %v842_v43  ;;  %v729_v31 = vsub.f32 %v697_v16, %v713_v24  ;;  %v752_v24 = vld [vmem:[%s2641_s6 + $0x18] sm:$0xff]  ;;  %vm836_vm14 = vmor %vm834_vm13, %vm835_vm12  ;;  %v650_v22 = vpop.xlane.xlu0 %649  ;;  %v861_v23 = vmul.f32 0.5, %v860_v54  ;;  %vm855_vm0 = vweird.f32 %v2615_v9 }
 0x163   : > { %v2721_v17 = vpop.eup %1761  ;;  %v909_v38 = vmul.f32 %v2717_v51, %v2669_v63  ;;  %v727_v20 = vsub.f32 %v695_v40, %v2567_v58  ;;  %v2734_v57 = vadd.f32 1e-05, %v744_v28  ;;  %v833_v50 = vmul.f32 %v2629_v0, %v832_v46  ;;  %vm856_vm1 = vmor %vm854_vm15, %vm855_vm0 }
 0x164   : > { %v2732_v7 = vpop.eup %1763  ;;  %v847_v13 = vsel %vm2727_vm11, %v2620_v19, %v843_v41  ;;  %v899_v58 = vmul.f32 %v2721_v17, %v2678_v18  ;;  %v745_v33 = vmax.f32 %v729_v31, 0.0  ;;  %v881_v28 = vmul.f32 0.5, %v880_v37 }
 0x165   : > { %v889_v53 = vmul.f32 %v2732_v7, %v2689_v1  ;;  %v743_v8 = vmax.f32 %v727_v20, 0.0  ;;  %1765 = vrsqrt.f32 %v2734_v57  ;;  %v2747_v44 = vmul.f32 %v847_v13, %v753_v21 }
 0x166   : > { %v837_v19 = vsel %vm836_vm14, %v2629_v0, %v833_v50  ;;  %v910_v6 = vmul.f32 %v2717_v51, %v909_v38  ;;  %v2752_v16 = vadd.f32 1e-05, %v745_v33  ;;  %v666_v54 = vadd.f32 %v650_v22, %v2488_v27  ;;  %v755_v50 = vld [vmem:[%s2641_s6 + $0x30] sm:$0xff] }
 0x167   : > { %v890_v43 = vmul.f32 %v2732_v7, %v889_v53  ;;  %v2754_v40 = vadd.f32 1e-05, %v743_v8  ;;  %1028 = vperm.xlu1 %1738, %v2747_v44   ;;  %v2757_v41 = vmul.f32 %v837_v19, %v752_v24  ;;  %v852_v46 = vsub.f32 1.5, %v851_v60  ;;  %v754_v60 = vld [vmem:[%s2641_s6 + $0x28] sm:$0xff] }
 0x168   : > { %v900_v31 = vmul.f32 %v2721_v17, %v899_v58  ;;  %1767 = vrsqrt.f32 %v2752_v16  ;;  %v698_v0 = vmul.f32 0.001953125, %v666_v54  ;;  %v862_v38 = vsub.f32 1.5, %v861_v23 }
 0x169   : > { %1769 = vrsqrt.f32 %v2754_v40  ;;  %1023 = vperm.xlu2 %1739, %v2757_v41   ;;  %v853_v37 = vmul.f32 %v2615_v9, %v852_v46  ;;  %v2767_v20 = vmul.f32 0.5, %v910_v6  ;;  %v891_v27 = vmul.f32 0.5, %v890_v43 }
 0x16a   : > { %vm865_vm2 = vweird.f32 %v2684_v42  ;;  %v872_v48 = vsub.f32 1.5, %v2714_v10  ;;  %v730_v12 = vsub.f32 %v698_v0, %v2607_v35  ;;  %v863_v58 = vmul.f32 %v2684_v42, %v862_v38 }
 0x16b   : > { %v2772_v21 = vpop.eup %1765  ;;  %v857_v13 = vsel %vm856_vm1, %v2615_v9, %v853_v37  ;;  %vm864_vm3 = vweird.f32 %v2634_v14  ;;  %v901_v53 = vmul.f32 0.5, %v900_v31  ;;  %vm875_vm5 = vweird.f32 %v2674_v62 }
 0x16c   : > { %v929_v33 = vmul.f32 %v2772_v21, %v2734_v57  ;;  %vm866_vm4 = vmor %vm864_vm3, %vm865_vm2  ;;  %v882_v8 = vsub.f32 1.5, %v881_v28  ;;  %v746_v10 = vmax.f32 %v730_v12, 0.0  ;;  %v2782_v24 = vmul.f32 %v857_v13, %v754_v60  ;;  %v758_v60 = vld [vmem:[%s2641_s6 + $0x48] sm:$0xff] }
 0x16d   : > { %v867_v35 = vsel %vm866_vm4, %v2684_v42, %v863_v58  ;;  %vm885_vm6 = vweird.f32 %v2667_v25  ;;  %v873_v23 = vmul.f32 %v2674_v62, %v872_v48  ;;  %vm884_vm7 = vweird.f32 %v2617_v52  ;;  %v757_v52 = vld [vmem:[%s2641_s6 + $0x40] sm:$0xff]  ;;  %v756_v58 = vld [vmem:[%s2641_s6 + $0x38] sm:$0xff] }
 0x16e   : > { %v2786_v9 = vpop.eup %1767  ;;  %v930_v22 = vmul.f32 %v2772_v21, %v929_v33  ;;  %v2789_v14 = vmul.f32 %v867_v35, %v755_v50  ;;  %v883_v19 = vmul.f32 %v2667_v25, %v882_v8  ;;  %v2797_v28 = vadd.f32 1e-05, %v746_v10  ;;  %vm2806_vm9 = vmor %vm884_vm7, %vm885_vm6 }
 0x16f   : > { %v2793_v6 = vpop.eup %1769  ;;  %v939_v43 = vmul.f32 %v2786_v9, %v2752_v16  ;;  %v892_v42 = vsub.f32 1.5, %v891_v27  ;;  %vm874_vm8 = vweird.f32 %v2624_v26  ;;  %vm894_vm11 = vweird.f32 %v2689_v1 }
 0x170   : > { %v931_v54 = vmul.f32 0.5, %v930_v22  ;;  %v919_v46 = vmul.f32 %v2793_v6, %v2754_v40  ;;  %1038 = vperm.xlu1 %1738, %v2789_v14   ;;  %1771 = vrsqrt.f32 %v2797_v28  ;;  %v887_v37 = vsel %vm2806_vm9, %v2667_v25, %v883_v19  ;;  %vm2821_vm10 = vmor %vm874_vm8, %vm875_vm5 }
 0x171   : > { %v940_v0 = vmul.f32 %v2786_v9, %v939_v43  ;;  %1033 = vperm.xlu2 %1739, %v2782_v24   ;;  %v893_v26 = vmul.f32 %v2732_v7, %v892_v42  ;;  %vm895_vm12 = vweird.f32 %v2732_v7  ;;  %v902_v48 = vsub.f32 1.5, %v901_v53 }
 0x172   : > { %v920_v38 = vmul.f32 %v2793_v6, %v919_v46  ;;  %v877_v25 = vsel %vm2821_vm10, %v2674_v62, %v873_v23  ;;  %vm896_vm13 = vmor %vm894_vm11, %vm895_vm12  ;;  %vm905_vm14 = vweird.f32 %v2721_v17  ;;  %v912_v13 = vsub.f32 1.5, %v2767_v20 }
 0x173   : > { %v941_v12 = vmul.f32 0.5, %v940_v0  ;;  %v966_v33 = vmul.f32 %v887_v37, %v757_v52  ;;  %v897_v8 = vsel %vm896_vm13, %v2732_v7, %v893_v26  ;;  %vm915_vm15 = vweird.f32 %v2717_v51  ;;  %v760_v0 = vld [vmem:[%s2641_s6 + $0x58] sm:$0xff]  ;;  %v762_v37 = vld [vmem:[%s2641_s6 + $0x68] sm:$0xff] }
 0x174   : > { %v921_v50 = vmul.f32 0.5, %v920_v38  ;;  %v2836_v1 = vmul.f32 %v897_v8, %v758_v60  ;;  %v903_v53 = vmul.f32 %v2721_v17, %v902_v48  ;;  %vm904_vm0 = vweird.f32 %v2678_v18  ;;  %v774_v18 = vld [vmem:[%s2893_s7 + $0x40] sm:$0xff] }
 0x175   : > { %vm925_vm1 = vweird.f32 %v2793_v6  ;;  %vm2841_vm2 = vmor %vm904_vm0, %vm905_vm14  ;;  %v913_v20 = vmul.f32 %v2717_v51, %v912_v13  ;;  %vm914_vm3 = vweird.f32 %v2669_v63  ;;  %v932_v10 = vsub.f32 1.5, %v931_v54  ;;  %v761_v63 = vld [vmem:[%s2641_s6 + $0x60] sm:$0xff] }
 0x176   : > { %v922_v7 = vsub.f32 1.5, %v921_v50  ;;  %v1772_v35 = vpop.eup %1771  ;;  %v965_v22 = vmul.f32 %v877_v25, %v756_v58  ;;  %1053 = vperm.xlu0 %1740, %v2836_v1   ;;  %vm2848_vm4 = vmor %vm914_vm3, %vm915_vm15  ;;  %vm924_vm5 = vweird.f32 %v2754_v40  ;;  %vm935_vm6 = vweird.f32 %v2772_v21  ;;  %v759_v40 = vld [vmem:[%s2641_s6 + $0x50] sm:$0xff] }
 0x177   : > { %v942_v23 = vsub.f32 1.5, %v941_v12  ;;  %v949_v19 = vmul.f32 %v1772_v35, %v2797_v28  ;;  %vm926_vm7 = vmor %vm924_vm5, %vm925_vm1  ;;  %v933_v42 = vmul.f32 %v2772_v21, %v932_v10  ;;  %vm934_vm8 = vweird.f32 %v2734_v57  ;;  %v763_v12 = vld [vmem:[%s2641_s6 + $0x70] sm:$0xff] }
 0x178   : > { %1048 = vperm.xlu1 %1738, %v966_v33   ;;  %v923_v43 = vmul.f32 %v2793_v6, %v922_v7  ;;  %v907_v54 = vsel %vm2841_vm2, %v2721_v17, %v903_v53  ;;  %vm936_vm9 = vmor %vm934_vm8, %vm935_vm6  ;;  %vm945_vm10 = vweird.f32 %v2786_v9  ;;  %v917_v52 = vsel %vm2848_vm4, %v2717_v51, %v913_v20 }
 0x179   : > { %1043 = vperm.xlu2 %1739, %v965_v22   ;;  %v943_v46 = vmul.f32 %v2786_v9, %v942_v23  ;;  %v950_v31 = vmul.f32 %v1772_v35, %v949_v19  ;;  %v937_v26 = vsel %vm936_vm9, %v2772_v21, %v933_v42  ;;  %vm944_vm11 = vweird.f32 %v2752_v16  ;;  %v764_v16 = vld [vmem:[%s2641_s6 + $0x78] sm:$0xff]  ;;  %v776_v19 = vld [vmem:[%s2893_s7 + $0x50] sm:$0xff] }
 0x17a   : > { %v927_v57 = vsel %vm926_vm7, %v2793_v6, %v923_v43  ;;  %v968_v27 = vmul.f32 %v907_v54, %v759_v40  ;;  %vm946_vm12 = vmor %vm944_vm11, %vm945_vm10  ;;  %v969_v60 = vmul.f32 %v917_v52, %v760_v0  ;;  %v971_v48 = vmul.f32 %v937_v26, %v762_v37  ;;  %v777_v23 = vld [vmem:[%s2893_s7 + $0x58] sm:$0xff]  ;;  %v775_v43 = vld [vmem:[%s2893_s7 + $0x48] sm:$0xff] }
 0x17b   : > { %v2874_v38 = vmul.f32 %v927_v57, %v761_v63  ;;  %v951_v17 = vmul.f32 0.5, %v950_v31  ;;  %v947_v25 = vsel %vm946_vm12, %v2786_v9, %v943_v46  ;;  %vm955_vm13 = vweird.f32 %v1772_v35  ;;  %v779_v54 = vld [vmem:[%s2893_s7 + $0x68] sm:$0xff]  ;;  %v778_v31 = vld [vmem:[%s2893_s7 + $0x60] sm:$0xff] }
 0x17c   : > { %v981_v51 = vmul.f32 %v965_v22, %v2517_v11  ;;  %vm954_vm14 = vweird.f32 %v2797_v28  ;;  %v972_v21 = vmul.f32 %v947_v25, %v763_v12  ;;  %v982_v50 = vmul.f32 %v966_v33, %v2527_v36  ;;  %v766_v28 = vld [vmem:[%s2893_s7] sm:$0xff] }
 0x17d   : > { %v952_v13 = vsub.f32 1.5, %v951_v17  ;;  %v984_v58 = vmul.f32 %v968_v27, %v2523_v55  ;;  %vm956_vm15 = vmor %vm954_vm14, %vm955_vm13  ;;  %v985_v9 = vmul.f32 %v969_v60, %v2543_v45  ;;  %v987_v8 = vmul.f32 %v971_v48, %v2536_v2  ;;  %v768_v2 = vld [vmem:[%s2893_s7 + $0x10] sm:$0xff] }
 0x17e   : > { %1068 = vperm.xlu0 %1740, %v2874_v38   ;;  %v988_v62 = vmul.f32 %v972_v21, %v2579_v47  ;;  %v976_v55 = vmul.f32 %v2671_v3, %v2496_v30  ;;  %v975_v36 = vmul.f32 %v2680_v56, %v2494_v29  ;;  %v974_v45 = vmul.f32 %v2704_v39, %v2498_v49  ;;  %v767_v47 = vld [vmem:[%s2893_s7 + $0x8] sm:$0xff]  ;;  %v770_v56 = vld [vmem:[%s2893_s7 + $0x20] sm:$0xff]  ;;  %v769_v39 = vld [vmem:[%s2893_s7 + $0x18] sm:$0xff] }
 0x17f   : > { %v953_v6 = vmul.f32 %v1772_v35, %v952_v13  ;;  %v979_v30 = vmul.f32 %v2782_v24, %v2510_v59  ;;  %v978_v29 = vmul.f32 %v2747_v44, %v2500_v4  ;;  %v771_v3 = vld [vmem:[%s2893_s7 + $0x28] sm:$0xff]  ;;  %v977_v49 = vmul.f32 %v2757_v41, %v2504_v5  ;;  %v773_v59 = vld [vmem:[%s2893_s7 + $0x38] sm:$0xff]  ;;  %v772_v44 = vld [vmem:[%s2893_s7 + $0x30] sm:$0xff] }
 0x180   : > { %1063 = vperm.xlu1 %1738, %v969_v60   ;;  %v992_v33 = vsub.f32 %v768_v2, %v976_v55  ;;  %v991_v20 = vsub.f32 %v767_v47, %v975_v36  ;;  %v990_v7 = vsub.f32 %v766_v28, %v974_v45  ;;  %v980_v4 = vmul.f32 %v2789_v14, %v2519_v15  ;;  %v780_v14 = vld [vmem:[%s2893_s7 + $0x70] sm:$0xff]  ;;  %v1150_v13 = vld [vmem:[%s2045_s13] sm:$0xff]  ;;  %v1776_v28 = vld [vmem:[%s2037_s20 + $0x108] sm:$0xff] }
 0x181   : > { %1058 = vperm.xlu2 %1739, %v968_v27   ;;  %v957_v11 = vsel %vm956_vm15, %v1772_v35, %v953_v6  ;;  %v995_v10 = vsub.f32 %v771_v3, %v979_v30  ;;  %v994_v35 = vsub.f32 %v770_v56, %v978_v29  ;;  %v993_v22 = vsub.f32 %v769_v39, %v977_v49  ;;  %v1156_v3 = vld [vmem:[%s2045_s13 + $0x30] sm:$0xff]  ;;  %v1157_v49 = vld [vmem:[%s2045_s13 + $0x38] sm:$0xff] }
 0x182   : > { %v973_v53 = vmul.f32 %v957_v11, %v764_v16  ;;  %v998_v24 = vsub.f32 %v774_v18, %v982_v50  ;;  %v997_v5 = vsub.f32 %v773_v59, %v981_v51  ;;  %v996_v41 = vsub.f32 %v772_v44, %v980_v4  ;;  %v1151_v51 = vld [vmem:[%s2045_s13 + $0x8] sm:$0xff]  ;;  %v1188_v56 = vld [vmem:[%s2045_s13 + $0x130] sm:$0xff]  ;;  %v1189_v39 = vld [vmem:[%s2045_s13 + $0x138] sm:$0xff] }
 0x183   : > { %v983_v63 = vmul.f32 %v2836_v1, %v2525_v32  ;;  %v1001_v42 = vsub.f32 %v777_v23, %v985_v9  ;;  %v1000_v40 = vsub.f32 %v776_v19, %v984_v58  ;;  %v986_v46 = vmul.f32 %v2874_v38, %v2539_v34  ;;  %v781_v1 = vld [vmem:[%s2893_s7 + $0x78] sm:$0xff]  ;;  %v1183_v16 = vld [vmem:[%s2045_s13 + $0x108] sm:$0xff]  ;;  %v1773_v58 = vld [vmem:[%s2037_s20] sm:$0xff] }
 0x184   : > { %v1004_v0 = vsub.f32 %v780_v14, %v988_v62  ;;  %v1003_v52 = vsub.f32 %v779_v54, %v987_v8  ;;  %v989_v32 = vmul.f32 %v973_v53, %v2576_v61  ;;  %v1774_v8 = vld [vmem:[%s2037_s20 + $0x8] sm:$0xff]  ;;  %v1778_v59 = vld [vmem:[%s2037_s20 + $0x38] sm:$0xff]  ;;  %v1779_v44 = vld [vmem:[%s2037_s20 + $0x130] sm:$0xff] }
 0x185   : > { %v999_v15 = vsub.f32 %v775_v43, %v983_v63  ;;  %v1002_v57 = vsub.f32 %v778_v31, %v986_v46  ;;  %v1780_v43 = vld [vmem:[%s2037_s20 + $0x138] sm:$0xff]  ;;  %v1162_v46 = vld [vmem:[%s2045_s13 + $0x60] sm:$0xff]  ;;  %v1163_v31 = vld [vmem:[%s2045_s13 + $0x68] sm:$0xff] }
 0x186   : > { %1083 = vperm.xlu0 %1740, %v973_v53   ;;  %v1005_v37 = vsub.f32 %v781_v1, %v989_v32  ;;  %v1775_v53 = vld [vmem:[%s2037_s20 + $0x100] sm:$0xff] }
 0x187   : > { %v1781_v1 = vld [vmem:[%s2037_s20 + $0x60] sm:$0xff] }
 0x188   : > { %1078 = vperm.xlu1 %1738, %v972_v21   ;;  %v1182_v21 = vld [vmem:[%s2045_s13 + $0x100] sm:$0xff] }
 0x189   : > { %1073 = vperm.xlu2 %1739, %v971_v48  }
 0x18e   : > { %1226 = vperm.xlu0 %1740, %v992_v33  }
 0x190   : > { %1221 = vperm.xlu1 %1738, %v991_v20  }
 0x191   : > { %1216 = vperm.xlu2 %1739, %v990_v7  }
 0x196   : > { %1241 = vperm.xlu0 %1740, %v995_v10  }
 0x198   : > { %1236 = vperm.xlu1 %1738, %v994_v35  }
 0x199   : > { %1231 = vperm.xlu2 %1739, %v993_v22   ;;  %v1777_v22 = vld [vmem:[%s2037_s20 + $0x30] sm:$0xff] }
 0x19e   : > { %1256 = vperm.xlu0 %1740, %v998_v24  }
 0x1a0   : > { %1251 = vperm.xlu1 %1738, %v997_v5  }
 0x1a1   : > { %1246 = vperm.xlu2 %1739, %v996_v41  }
 0x1a6   : > { %1271 = vperm.xlu0 %1740, %v1001_v42  }
 0x1a8   : > { %1266 = vperm.xlu1 %1738, %v1000_v40  }
 0x1a9   : > { %1261 = vperm.xlu2 %1739, %v999_v15  }
 0x1ae   : > { %1286 = vperm.xlu0 %1740, %v1004_v0   ;;  %v1194_v0 = vld [vmem:[%s2045_s13 + $0x160] sm:$0xff] }
 0x1b0   : > { %1281 = vperm.xlu1 %1738, %v1003_v52   ;;  %v1195_v52 = vld [vmem:[%s2045_s13 + $0x168] sm:$0xff] }
 0x1b1   : > { %1276 = vperm.xlu2 %1739, %v1002_v57  }
 0x1b6   : > { %v2930_v26 = vpop.permute.xlu2 %1013 }
 0x1b9   : > { %1291 = vperm.xlu2 %1739, %v1005_v37  }
 0x1c3   : > { %v1024_v34 = vpop.permute.xlu2 %1023 }
 0x1c4   : > { %v1092_v18 = vmul.f32 %v1777_v22, %v1024_v34  ;;  %v1093_v4 = vmul.f32 %v1778_v59, %v1024_v34  ;;  %v1124_v24 = vmul.f32 %v1779_v44, %v1024_v34  ;;  %v1125_v42 = vmul.f32 %v1780_v43, %v1024_v34  ;;  %v1782_v34 = vld [vmem:[%s2037_s20 + $0x68] sm:$0xff]  ;;  %v1200_v22 = vld [vmem:[%s2045_s13 + $0x190] sm:$0xff] }
 0x1cb   : > { %v2932_v38 = vpop.permute.xlu2 %1033 }
 0x1cd   : > { %v2940_v61 = vpop.permute.xlu0 %1018 }
 0x1d1   : > { %v1009_v17 = vpop.permute.xlu1 %1008 }
 0x1d2   : > { %v1086_v9 = vmul.f32 %v1773_v58, %v1009_v17  ;;  %v1087_v11 = vmul.f32 %v1774_v8, %v1009_v17  ;;  %v1118_v62 = vmul.f32 %v1775_v53, %v1009_v17  ;;  %v1119_v33 = vmul.f32 %v1776_v28, %v1009_v17  ;;  %v1184_v28 = vld [vmem:[%s2045_s13 + $0x110] sm:$0xff] }
 0x1d3   : > { %v2934_v27 = vpop.permute.xlu2 %1043 }
 0x1d9   : > { %v2936_v60 = vpop.permute.xlu1 %1028 }
 0x1db   : > { %v2938_v48 = vpop.permute.xlu2 %1058 }
 0x1e2   : > { %v2942_v12 = vpop.permute.xlu1 %1038 }
 0x1e3   : > { %v2944_v25 = vpop.permute.xlu2 %1073  ;;  %v1098_v37 = vmul.f32 %v1781_v1, %v2942_v12  ;;  %v1099_v17 = vmul.f32 %v1782_v34, %v2942_v12  ;;  %v1186_v34 = vld [vmem:[%s2045_s13 + $0x120] sm:$0xff] }
 0x1e8   : > { %v2950_v6 = vpop.permute.xlu0 %1053 }
 0x1ea   : > { %v2952_v50 = vpop.permute.xlu1 %1048 }
 0x1eb   : > { %v1217_v55 = vpop.permute.xlu2 %1216 }
 0x1ec   : > { %v1294_v36 = vadd.f32 %v1217_v55, %v1150_v13  ;;  %v1295_v2 = vadd.f32 %v1217_v55, %v1151_v51  ;;  %v1326_v45 = vadd.f32 %v1217_v55, %v1182_v21  ;;  %v1327_v47 = vadd.f32 %v1217_v55, %v1183_v16  ;;  %v1783_v13 = vld [vmem:[%s2037_s20 + $0x160] sm:$0xff] }
 0x1ed   : > { %v1130_v51 = vmul.f32 %v1783_v13, %v2942_v12 }
 0x1ee   : > { %v1358_v20 = vadd.f32 %v1294_v36, %v1086_v9  ;;  %v1359_v7 = vadd.f32 %v1295_v2, %v1087_v11  ;;  %v1390_v30 = vadd.f32 %v1326_v45, %v1118_v62  ;;  %v1391_v29 = vadd.f32 %v1327_v47, %v1119_v33  ;;  %v1784_v11 = vld [vmem:[%s2037_s20 + $0x168] sm:$0xff]  ;;  %v1152_v45 = vld [vmem:[%s2045_s13 + $0x10] sm:$0xff]  ;;  %v1153_v47 = vld [vmem:[%s2045_s13 + $0x18] sm:$0xff] }
 0x1ef   : > { %v1131_v53 = vmul.f32 %v1784_v11, %v2942_v12  ;;  %v1185_v33 = vld [vmem:[%s2045_s13 + $0x118] sm:$0xff] }
 0x1f0   : > { %1422 = vst [vmem:[%s2959_s30] sm:$0xff] %v1358_v20  ;;  %v2967_v10 = vpop.permute.xlu0 %1068  ;;  %v1168_v20 = vld [vmem:[%s2045_s13 + $0x90] sm:$0xff] }
 0x1f1   : > { %1423 = vst [vmem:[%s2959_s30 + $0x8] sm:$0xff] %v1359_v7  ;;  %v1169_v7 = vld [vmem:[%s2045_s13 + $0x98] sm:$0xff] }
 0x1f2   : > { %1454 = vst [vmem:[%s2959_s30 + $0x100] sm:$0xff] %v1390_v30  ;;  %v2970_v35 = vpop.permute.xlu1 %1063  ;;  %v1785_v30 = vld [vmem:[%s2037_s20 + $0x10] sm:$0xff] }
 0x1f3   : > { %1455 = vst [vmem:[%s2959_s30 + $0x108] sm:$0xff] %v1391_v29  ;;  %v1232_v5 = vpop.permute.xlu2 %1231  ;;  %v1088_v12 = vmul.f32 %v1785_v30, %v2930_v26  ;;  %v1786_v29 = vld [vmem:[%s2037_s20 + $0x18] sm:$0xff]  ;;  %v1795_v30 = vld [vmem:[%s2037_s20 + $0x120] sm:$0xff] }
 0x1f4   : > { %v1300_v41 = vadd.f32 %v1232_v5, %v1156_v3  ;;  %v1301_v23 = vadd.f32 %v1232_v5, %v1157_v49  ;;  %v1332_v19 = vadd.f32 %v1232_v5, %v1188_v56  ;;  %v1333_v63 = vadd.f32 %v1232_v5, %v1189_v39  ;;  %v1787_v49 = vld [vmem:[%s2037_s20 + $0x110] sm:$0xff] }
 0x1f5   : > { %v1089_v3 = vmul.f32 %v1786_v29, %v2930_v26  ;;  %v1120_v56 = vmul.f32 %v1787_v49, %v2930_v26 }
 0x1f6   : > { %v1364_v40 = vadd.f32 %v1300_v41, %v1092_v18  ;;  %v1365_v15 = vadd.f32 %v1301_v23, %v1093_v4  ;;  %v1396_v14 = vadd.f32 %v1332_v19, %v1124_v24  ;;  %v1397_v54 = vadd.f32 %v1333_v63, %v1125_v42  ;;  %v1201_v24 = vld [vmem:[%s2045_s13 + $0x198] sm:$0xff]  ;;  %v1789_v19 = vld [vmem:[%s2037_s20 + $0x90] sm:$0xff] }
 0x1f7   : > { %v1788_v41 = vld [vmem:[%s2037_s20 + $0x118] sm:$0xff]  ;;  %v1104_v63 = vmul.f32 %v1789_v19, %v2950_v6  ;;  %v1798_v19 = vld [vmem:[%s2037_s20 + $0x48] sm:$0xff] }
 0x1f8   : > { %1428 = vst [vmem:[%s2959_s30 + $0x30] sm:$0xff] %v1364_v40  ;;  %v2986_v32 = vpop.permute.xlu0 %1083  ;;  %v1121_v23 = vmul.f32 %v1788_v41, %v2930_v26  ;;  %v1154_v40 = vld [vmem:[%s2045_s13 + $0x20] sm:$0xff] }
 0x1f9   : > { %1429 = vst [vmem:[%s2959_s30 + $0x38] sm:$0xff] %v1365_v15 }
 0x1fa   : > { %1460 = vst [vmem:[%s2959_s30 + $0x130] sm:$0xff] %v1396_v14  ;;  %v2984_v57 = vpop.permute.xlu1 %1078 }
 0x1fb   : > { %1461 = vst [vmem:[%s2959_s30 + $0x138] sm:$0xff] %v1397_v54  ;;  %v1247_v21 = vpop.permute.xlu2 %1246 }
 0x1fc   : > { %v1306_v16 = vadd.f32 %v1247_v21, %v1162_v46  ;;  %v1307_v58 = vadd.f32 %v1247_v21, %v1163_v31  ;;  %v1338_v9 = vadd.f32 %v1247_v21, %v1194_v0  ;;  %v1339_v8 = vadd.f32 %v1247_v21, %v1195_v52  ;;  %v1155_v0 = vld [vmem:[%s2045_s13 + $0x28] sm:$0xff]  ;;  %v1790_v52 = vld [vmem:[%s2037_s20 + $0x98] sm:$0xff] }
 0x1fd   : > { %v1105_v26 = vmul.f32 %v1790_v52, %v2950_v6  ;;  %v1187_v21 = vld [vmem:[%s2045_s13 + $0x128] sm:$0xff] }
 0x1fe   : > { %v1370_v62 = vadd.f32 %v1306_v16, %v1098_v37  ;;  %v1371_v55 = vadd.f32 %v1307_v58, %v1099_v17  ;;  %v1402_v36 = vadd.f32 %v1338_v9, %v1130_v51  ;;  %v1403_v2 = vadd.f32 %v1339_v8, %v1131_v53  ;;  %v1791_v17 = vld [vmem:[%s2037_s20 + $0x190] sm:$0xff]  ;;  %v1792_v58 = vld [vmem:[%s2037_s20 + $0x198] sm:$0xff]  ;;  %v1158_v53 = vld [vmem:[%s2045_s13 + $0x40] sm:$0xff] }
 0x1ff   : > { %v1136_v13 = vmul.f32 %v1791_v17, %v2950_v6  ;;  %v1137_v9 = vmul.f32 %v1792_v58, %v2950_v6 }
 0x200   : > { %1434 = vst [vmem:[%s2959_s30 + $0x60] sm:$0xff] %v1370_v62  ;;  %v1227_v15 = vpop.permute.xlu0 %1226  ;;  %v1793_v62 = vld [vmem:[%s2037_s20 + $0x20] sm:$0xff] }
 0x201   : > { %1435 = vst [vmem:[%s2959_s30 + $0x68] sm:$0xff] %v1371_v55  ;;  %v1298_v16 = vadd.f32 %v1227_v15, %v1154_v40  ;;  %v1299_v11 = vadd.f32 %v1227_v15, %v1155_v0  ;;  %v1090_v55 = vmul.f32 %v1793_v62, %v2940_v61  ;;  %v1800_v0 = vld [vmem:[%s2037_s20 + $0x148] sm:$0xff] }
 0x202   : > { %1466 = vst [vmem:[%s2959_s30 + $0x160] sm:$0xff] %v1402_v36  ;;  %v1222_v39 = vpop.permute.xlu1 %1221  ;;  %v1127_v52 = vmul.f32 %v1800_v0, %v2936_v60  ;;  %v1212_v0 = vld [vmem:[%s2045_s13 + $0x1f0] sm:$0xff] }
 0x203   : > { %1467 = vst [vmem:[%s2959_s30 + $0x168] sm:$0xff] %v1403_v2  ;;  %v1296_v18 = vadd.f32 %v1222_v39, %v1152_v45  ;;  %v1297_v59 = vadd.f32 %v1222_v39, %v1153_v47  ;;  %v1328_v4 = vadd.f32 %v1222_v39, %v1184_v28  ;;  %v1329_v44 = vadd.f32 %v1222_v39, %v1185_v33  ;;  %v1262_v5 = vpop.permute.xlu2 %1261  ;;  %v1159_v45 = vld [vmem:[%s2045_s13 + $0x48] sm:$0xff] }
 0x204   : > { %v1312_v43 = vadd.f32 %v1262_v5, %v1168_v20  ;;  %v1313_v42 = vadd.f32 %v1262_v5, %v1169_v7  ;;  %v1344_v31 = vadd.f32 %v1262_v5, %v1200_v22  ;;  %v1345_v37 = vadd.f32 %v1262_v5, %v1201_v24  ;;  %v1794_v47 = vld [vmem:[%s2037_s20 + $0x28] sm:$0xff]  ;;  %v1190_v20 = vld [vmem:[%s2045_s13 + $0x140] sm:$0xff] }
 0x205   : > { %v1360_v14 = vadd.f32 %v1296_v18, %v1088_v12  ;;  %v1361_v54 = vadd.f32 %v1297_v59, %v1089_v3  ;;  %v1392_v46 = vadd.f32 %v1328_v4, %v1120_v56  ;;  %v1393_v1 = vadd.f32 %v1329_v44, %v1121_v23  ;;  %v1191_v3 = vld [vmem:[%s2045_s13 + $0x148] sm:$0xff]  ;;  %v1174_v59 = vld [vmem:[%s2045_s13 + $0xc0] sm:$0xff] }
 0x206   : > { %v1376_v51 = vadd.f32 %v1312_v43, %v1104_v63  ;;  %v1377_v8 = vadd.f32 %v1313_v42, %v1105_v26  ;;  %v1408_v36 = vadd.f32 %v1344_v31, %v1136_v13  ;;  %v1330_v2 = vadd.f32 %v1227_v15, %v1186_v34  ;;  %v1796_v56 = vld [vmem:[%s2037_s20 + $0x128] sm:$0xff]  ;;  %v1797_v44 = vld [vmem:[%s2037_s20 + $0x40] sm:$0xff] }
 0x207   : > { %1424 = vst [vmem:[%s2959_s30 + $0x10] sm:$0xff] %v1360_v14  ;;  %v1091_v6 = vmul.f32 %v1794_v47, %v2940_v61  ;;  %v1409_v28 = vadd.f32 %v1345_v37, %v1137_v9  ;;  %v1331_v33 = vadd.f32 %v1227_v15, %v1187_v21  ;;  %v1122_v12 = vmul.f32 %v1795_v30, %v2940_v61  ;;  %v1175_v23 = vld [vmem:[%s2045_s13 + $0xc8] sm:$0xff]  ;;  %v1206_v42 = vld [vmem:[%s2045_s13 + $0x1c0] sm:$0xff]  ;;  %v1160_v37 = vld [vmem:[%s2045_s13 + $0x50] sm:$0xff] }
 0x208   : > { %1425 = vst [vmem:[%s2959_s30 + $0x18] sm:$0xff] %v1361_v54  ;;  %v1362_v29 = vadd.f32 %v1298_v16, %v1090_v55  ;;  %v1123_v39 = vmul.f32 %v1796_v56, %v2940_v61  ;;  %v1094_v24 = vmul.f32 %v1797_v44, %v2936_v60  ;;  %v1095_v61 = vmul.f32 %v1798_v19, %v2936_v60  ;;  %v1242_v40 = vpop.permute.xlu0 %1241  ;;  %v1799_v15 = vld [vmem:[%s2037_s20 + $0x140] sm:$0xff]  ;;  %v1161_v21 = vld [vmem:[%s2045_s13 + $0x58] sm:$0xff]  ;;  %v1802_v16 = vld [vmem:[%s2037_s20 + $0xc8] sm:$0xff] }
 0x209   : > { %1456 = vst [vmem:[%s2959_s30 + $0x110] sm:$0xff] %v1392_v46  ;;  %v1363_v22 = vadd.f32 %v1299_v11, %v1091_v6  ;;  %v1394_v5 = vadd.f32 %v1330_v2, %v1122_v12  ;;  %v1126_v14 = vmul.f32 %v1799_v15, %v2936_v60  ;;  %v1207_v46 = vld [vmem:[%s2045_s13 + $0x1c8] sm:$0xff]  ;;  %v1801_v34 = vld [vmem:[%s2037_s20 + $0xc0] sm:$0xff]  ;;  %v1111_v60 = vmul.f32 %v1802_v16, %v2967_v10  ;;  %v1193_v55 = vld [vmem:[%s2045_s13 + $0x158] sm:$0xff] }
 0x20a   : > { %1457 = vst [vmem:[%s2959_s30 + $0x118] sm:$0xff] %v1393_v1  ;;  %v1237_v7 = vpop.permute.xlu1 %1236  ;;  %v1395_v63 = vadd.f32 %v1331_v33, %v1123_v39  ;;  %v1110_v17 = vmul.f32 %v1801_v34, %v2967_v10  ;;  %v1803_v11 = vld [vmem:[%s2037_s20 + $0x1c0] sm:$0xff]  ;;  %v1804_v2 = vld [vmem:[%s2037_s20 + $0x1c8] sm:$0xff]  ;;  %v1305_v6 = vadd.f32 %v1242_v40, %v1161_v21  ;;  %v1337_v56 = vadd.f32 %v1242_v40, %v1193_v55  ;;  %v1196_v39 = vld [vmem:[%s2045_s13 + $0x170] sm:$0xff] }
 0x20b   : > { %1440 = vst [vmem:[%s2959_s30 + $0x90] sm:$0xff] %v1376_v51  ;;  %v1302_v49 = vadd.f32 %v1237_v7, %v1158_v53  ;;  %v1303_v18 = vadd.f32 %v1237_v7, %v1159_v45  ;;  %v1277_v4 = vpop.permute.xlu2 %1276  ;;  %v1334_v41 = vadd.f32 %v1237_v7, %v1190_v20  ;;  %v1335_v43 = vadd.f32 %v1237_v7, %v1191_v3  ;;  %v1805_v20 = vld [vmem:[%s2037_s20 + $0x50] sm:$0xff]  ;;  %v1806_v3 = vld [vmem:[%s2037_s20 + $0x58] sm:$0xff]  ;;  %v1166_v16 = vld [vmem:[%s2045_s13 + $0x80] sm:$0xff] }
 0x20c   : > { %1441 = vst [vmem:[%s2959_s30 + $0x98] sm:$0xff] %v1377_v8  ;;  %v1318_v31 = vadd.f32 %v1277_v4, %v1174_v59  ;;  %v1319_v1 = vadd.f32 %v1277_v4, %v1175_v23  ;;  %v1350_v51 = vadd.f32 %v1277_v4, %v1206_v42  ;;  %v1351_v9 = vadd.f32 %v1277_v4, %v1207_v46  ;;  %v1192_v8 = vld [vmem:[%s2045_s13 + $0x150] sm:$0xff]  ;;  %v1197_v4 = vld [vmem:[%s2045_s13 + $0x178] sm:$0xff] }
 0x20d   : > { %1472 = vst [vmem:[%s2959_s30 + $0x190] sm:$0xff] %v1408_v36  ;;  %v1366_v54 = vadd.f32 %v1302_v49, %v1094_v24  ;;  %v1367_v26 = vadd.f32 %v1303_v18, %v1095_v61  ;;  %v1398_v13 = vadd.f32 %v1334_v41, %v1126_v14  ;;  %v1399_v58 = vadd.f32 %v1335_v43, %v1127_v52  ;;  %v1808_v24 = vld [vmem:[%s2037_s20 + $0x158] sm:$0xff]  ;;  %v1180_v19 = vld [vmem:[%s2045_s13 + $0xf0] sm:$0xff] }
 0x20e   : > { %1473 = vst [vmem:[%s2959_s30 + $0x198] sm:$0xff] %v1409_v28  ;;  %v1142_v53 = vmul.f32 %v1803_v11, %v2967_v10  ;;  %v1382_v62 = vadd.f32 %v1318_v31, %v1110_v17  ;;  %v1304_v36 = vadd.f32 %v1242_v40, %v1160_v37  ;;  %v1143_v45 = vmul.f32 %v1804_v2, %v2967_v10  ;;  %v1164_v28 = vld [vmem:[%s2045_s13 + $0x70] sm:$0xff]  ;;  %v1181_v14 = vld [vmem:[%s2045_s13 + $0xf8] sm:$0xff]  ;;  %v1167_v11 = vld [vmem:[%s2045_s13 + $0x88] sm:$0xff] }
 0x20f   : > { %1426 = vst [vmem:[%s2959_s30 + $0x20] sm:$0xff] %v1362_v29  ;;  %v1383_v47 = vadd.f32 %v1319_v1, %v1111_v60  ;;  %v1096_v7 = vmul.f32 %v1805_v20, %v2932_v38  ;;  %v1336_v12 = vadd.f32 %v1242_v40, %v1192_v8  ;;  %v1165_v29 = vld [vmem:[%s2045_s13 + $0x78] sm:$0xff]  ;;  %v1097_v10 = vmul.f32 %v1806_v3, %v2932_v38  ;;  %v1809_v43 = vld [vmem:[%s2037_s20 + $0x70] sm:$0xff]  ;;  %v1817_v3 = vld [vmem:[%s2037_s20 + $0x80] sm:$0xff] }
 0x210   : > { %1427 = vst [vmem:[%s2959_s30 + $0x28] sm:$0xff] %v1363_v22  ;;  %v1414_v30 = vadd.f32 %v1350_v51, %v1142_v53  ;;  %v1415_v49 = vadd.f32 %v1351_v9, %v1143_v45  ;;  %v1807_v22 = vld [vmem:[%s2037_s20 + $0x150] sm:$0xff]  ;;  %v1100_v42 = vmul.f32 %v1809_v43, %v2934_v27  ;;  %v1213_v37 = vld [vmem:[%s2045_s13 + $0x1f8] sm:$0xff] }
 0x211   : > { %1458 = vst [vmem:[%s2959_s30 + $0x120] sm:$0xff] %v1394_v5  ;;  %v1128_v18 = vmul.f32 %v1807_v22, %v2932_v38  ;;  %v1368_v59 = vadd.f32 %v1304_v36, %v1096_v7  ;;  %v1129_v5 = vmul.f32 %v1808_v24, %v2932_v38  ;;  %v1369_v41 = vadd.f32 %v1305_v6, %v1097_v10  ;;  %v1810_v38 = vld [vmem:[%s2037_s20 + $0x78] sm:$0xff]  ;;  %v1811_v52 = vld [vmem:[%s2037_s20 + $0x170] sm:$0xff]  ;;  %v1198_v36 = vld [vmem:[%s2045_s13 + $0x180] sm:$0xff] }
 0x212   : > { %1459 = vst [vmem:[%s2959_s30 + $0x128] sm:$0xff] %v1395_v63  ;;  %v1252_v33 = vpop.permute.xlu1 %1251  ;;  %v1257_v63 = vpop.permute.xlu0 %1256  ;;  %v1812_v17 = vld [vmem:[%s2037_s20 + $0x178] sm:$0xff]  ;;  %v1813_v60 = vld [vmem:[%s2037_s20 + $0xf0] sm:$0xff]  ;;  %v1102_v10 = vmul.f32 %v1817_v3, %v2952_v50  ;;  %v1818_v22 = vld [vmem:[%s2037_s20 + $0x88] sm:$0xff] }
 0x213   : > { %1430 = vst [vmem:[%s2959_s30 + $0x40] sm:$0xff] %v1366_v54  ;;  %v1308_v44 = vadd.f32 %v1252_v33, %v1164_v28  ;;  %v1309_v23 = vadd.f32 %v1252_v33, %v1165_v29  ;;  %v1292_v61 = vpop.permute.xlu2 %1291  ;;  %v1400_v40 = vadd.f32 %v1336_v12, %v1128_v18  ;;  %v1340_v15 = vadd.f32 %v1252_v33, %v1196_v39  ;;  %v1814_v53 = vld [vmem:[%s2037_s20 + $0xf8] sm:$0xff]  ;;  %v1815_v45 = vld [vmem:[%s2037_s20 + $0x1f0] sm:$0xff]  ;;  %v1199_v28 = vld [vmem:[%s2045_s13 + $0x188] sm:$0xff] }
 0x214   : > { %1431 = vst [vmem:[%s2959_s30 + $0x48] sm:$0xff] %v1367_v26  ;;  %v1101_v54 = vmul.f32 %v1810_v38, %v2934_v27  ;;  %v1401_v46 = vadd.f32 %v1337_v56, %v1129_v5  ;;  %v1341_v31 = vadd.f32 %v1252_v33, %v1197_v4  ;;  %v1132_v26 = vmul.f32 %v1811_v52, %v2934_v27  ;;  %v1816_v20 = vld [vmem:[%s2037_s20 + $0x1f8] sm:$0xff]  ;;  %v1170_v29 = vld [vmem:[%s2045_s13 + $0xa0] sm:$0xff]  ;;  %v1171_v39 = vld [vmem:[%s2045_s13 + $0xa8] sm:$0xff] }
 0x215   : > { %1462 = vst [vmem:[%s2959_s30 + $0x140] sm:$0xff] %v1398_v13  ;;  %v1372_v1 = vadd.f32 %v1308_v44, %v1100_v42  ;;  %v1324_v34 = vadd.f32 %v1292_v61, %v1180_v19  ;;  %v1133_v13 = vmul.f32 %v1812_v17, %v2934_v27  ;;  %v1325_v21 = vadd.f32 %v1292_v61, %v1181_v14  ;;  %v1202_v4 = vld [vmem:[%s2045_s13 + $0x1a0] sm:$0xff]  ;;  %v1205_v17 = vld [vmem:[%s2045_s13 + $0x1b8] sm:$0xff] }
 0x216   : > { %1463 = vst [vmem:[%s2959_s30 + $0x148] sm:$0xff] %v1399_v58  ;;  %v1373_v51 = vadd.f32 %v1309_v23, %v1101_v54  ;;  %v1116_v58 = vmul.f32 %v1813_v60, %v2986_v32  ;;  %v1404_v9 = vadd.f32 %v1340_v15, %v1132_v26  ;;  %v1356_v8 = vadd.f32 %v1292_v61, %v1212_v0  ;;  %v1819_v24 = vld [vmem:[%s2037_s20 + $0x180] sm:$0xff]  ;;  %v1203_v23 = vld [vmem:[%s2045_s13 + $0x1a8] sm:$0xff]  ;;  %v1204_v26 = vld [vmem:[%s2045_s13 + $0x1b0] sm:$0xff] }
 0x217   : > { %1446 = vst [vmem:[%s2959_s30 + $0xc0] sm:$0xff] %v1382_v62  ;;  %v1117_v27 = vmul.f32 %v1814_v53, %v2986_v32  ;;  %v1405_v62 = vadd.f32 %v1341_v31, %v1133_v13  ;;  %v1357_v55 = vadd.f32 %v1292_v61, %v1213_v37  ;;  %v1310_v33 = vadd.f32 %v1257_v63, %v1166_v16  ;;  %v1820_v61 = vld [vmem:[%s2037_s20 + $0x188] sm:$0xff]  ;;  %v1821_v15 = vld [vmem:[%s2037_s20 + $0xa0] sm:$0xff] }
 0x218   : > { %1447 = vst [vmem:[%s2959_s30 + $0xc8] sm:$0xff] %v1383_v47  ;;  %v1148_v47 = vmul.f32 %v1815_v45, %v2986_v32  ;;  %v1388_v6 = vadd.f32 %v1324_v34, %v1116_v58  ;;  %v1149_v7 = vmul.f32 %v1816_v20, %v2986_v32  ;;  %v1311_v12 = vadd.f32 %v1257_v63, %v1167_v11  ;;  %v1822_v31 = vld [vmem:[%s2037_s20 + $0xa8] sm:$0xff]  ;;  %v1176_v58 = vld [vmem:[%s2045_s13 + $0xd0] sm:$0xff]  ;;  %v1178_v3 = vld [vmem:[%s2045_s13 + $0xe0] sm:$0xff] }
 0x219   : > { %1478 = vst [vmem:[%s2959_s30 + $0x1c0] sm:$0xff] %v1414_v30  ;;  %v1389_v30 = vadd.f32 %v1325_v21, %v1117_v27  ;;  %v1342_v56 = vadd.f32 %v1257_v63, %v1198_v36  ;;  %v1103_v32 = vmul.f32 %v1818_v22, %v2952_v50  ;;  %v1134_v5 = vmul.f32 %v1819_v24, %v2952_v50  ;;  %v1208_v45 = vld [vmem:[%s2045_s13 + $0x1d0] sm:$0xff] }
 0x21a   : > { %1479 = vst [vmem:[%s2959_s30 + $0x1c8] sm:$0xff] %v1415_v49  ;;  %v1267_v2 = vpop.permute.xlu1 %1266  ;;  %v1420_v49 = vadd.f32 %v1356_v8, %v1148_v47  ;;  %v1421_v18 = vadd.f32 %v1357_v55, %v1149_v7  ;;  %v1272_v44 = vpop.permute.xlu0 %1271  ;;  %v1135_v43 = vmul.f32 %v1820_v61, %v2952_v50  ;;  %v1106_v14 = vmul.f32 %v1821_v15, %v2938_v48  ;;  %v1825_v8 = vld [vmem:[%s2037_s20 + $0xb0] sm:$0xff]  ;;  %v1826_v55 = vld [vmem:[%s2037_s20 + $0xb8] sm:$0xff] }
 0x21b   : > { %1432 = vst [vmem:[%s2959_s30 + $0x50] sm:$0xff] %v1368_v59  ;;  %v1343_v59 = vadd.f32 %v1257_v63, %v1199_v28  ;;  %v1314_v19 = vadd.f32 %v1267_v2, %v1170_v29  ;;  %v1375_v63 = vadd.f32 %v1311_v12, %v1103_v32  ;;  %v1315_v42 = vadd.f32 %v1267_v2, %v1171_v39  ;;  %v1827_v47 = vld [vmem:[%s2037_s20 + $0x1b0] sm:$0xff]  ;;  %v1828_v7 = vld [vmem:[%s2037_s20 + $0x1b8] sm:$0xff]  ;;  %v1179_v32 = vld [vmem:[%s2045_s13 + $0xe8] sm:$0xff] }
 0x21c   : > { %1433 = vst [vmem:[%s2959_s30 + $0x58] sm:$0xff] %v1369_v41  ;;  %v1374_v41 = vadd.f32 %v1310_v33, %v1102_v10  ;;  %v1406_v38 = vadd.f32 %v1342_v56, %v1134_v5  ;;  %v1346_v54 = vadd.f32 %v1267_v2, %v1202_v4  ;;  %v1107_v50 = vmul.f32 %v1822_v31, %v2938_v48  ;;  %v1209_v33 = vld [vmem:[%s2045_s13 + $0x1d8] sm:$0xff]  ;;  %v1831_v24 = vld [vmem:[%s2037_s20 + $0x1d0] sm:$0xff] }
 0x21d   : > { %1464 = vst [vmem:[%s2959_s30 + $0x150] sm:$0xff] %v1400_v40  ;;  %v1172_v40 = vld [vmem:[%s2045_s13 + $0xb0] sm:$0xff]  ;;  %v1407_v0 = vadd.f32 %v1343_v59, %v1135_v43  ;;  %v1347_v52 = vadd.f32 %v1267_v2, %v1203_v23  ;;  %v1378_v34 = vadd.f32 %v1314_v19, %v1106_v14  ;;  %v1108_v11 = vmul.f32 %v1825_v8, %v2970_v35  ;;  %v1211_v23 = vld [vmem:[%s2045_s13 + $0x1e8] sm:$0xff]  ;;  %v1832_v61 = vld [vmem:[%s2037_s20 + $0x1d8] sm:$0xff] }
 0x21e   : > { %1465 = vst [vmem:[%s2959_s30 + $0x158] sm:$0xff] %v1401_v46  ;;  %v1173_v46 = vld [vmem:[%s2045_s13 + $0xb8] sm:$0xff]  ;;  %v1316_v13 = vadd.f32 %v1272_v44, %v1172_v40  ;;  %v1379_v16 = vadd.f32 %v1315_v42, %v1107_v50  ;;  %v1348_v27 = vadd.f32 %v1272_v44, %v1204_v26  ;;  %v1349_v2 = vadd.f32 %v1272_v44, %v1205_v17  ;;  %v1833_v40 = vld [vmem:[%s2037_s20 + $0xe0] sm:$0xff]  ;;  %v1836_v26 = vld [vmem:[%s2037_s20 + $0x1e8] sm:$0xff] }
 0x21f   : > { %1436 = vst [vmem:[%s2959_s30 + $0x70] sm:$0xff] %v1372_v1  ;;  %v1823_v1 = vld [vmem:[%s2037_s20 + $0x1a0] sm:$0xff]  ;;  %v1317_v60 = vadd.f32 %v1272_v44, %v1173_v46  ;;  %v1144_v5 = vmul.f32 %v1831_v24, %v2944_v25  ;;  %v1145_v43 = vmul.f32 %v1832_v61, %v2944_v25  ;;  %v1114_v15 = vmul.f32 %v1833_v40, %v2984_v57 }
 0x220   : > { %1437 = vst [vmem:[%s2959_s30 + $0x78] sm:$0xff] %v1373_v51  ;;  %v1138_v37 = vmul.f32 %v1823_v1, %v2938_v48  ;;  %v1824_v51 = vld [vmem:[%s2037_s20 + $0x1a8] sm:$0xff]  ;;  %v1380_v28 = vadd.f32 %v1316_v13, %v1108_v11  ;;  %v1210_v44 = vld [vmem:[%s2045_s13 + $0x1e0] sm:$0xff]  ;;  %v1147_v1 = vmul.f32 %v1836_v26, %v2984_v57 }
 0x221   : > { %1468 = vst [vmem:[%s2959_s30 + $0x170] sm:$0xff] %v1404_v9  ;;  %v1139_v21 = vmul.f32 %v1824_v51, %v2938_v48  ;;  %v1109_v48 = vmul.f32 %v1826_v55, %v2970_v35  ;;  %v1835_v50 = vld [vmem:[%s2037_s20 + $0x1e0] sm:$0xff] }
 0x222   : > { %1469 = vst [vmem:[%s2959_s30 + $0x178] sm:$0xff] %v1405_v62  ;;  %v1282_v9 = vpop.permute.xlu1 %1281  ;;  %v1410_v53 = vadd.f32 %v1346_v54, %v1138_v37  ;;  %v1177_v62 = vld [vmem:[%s2045_s13 + $0xd8] sm:$0xff]  ;;  %v1287_v10 = vpop.permute.xlu0 %1286  ;;  %v1834_v54 = vld [vmem:[%s2037_s20 + $0xe8] sm:$0xff] }
 0x223   : > { %1452 = vst [vmem:[%s2959_s30 + $0xf0] sm:$0xff] %v1388_v6  ;;  %v1411_v36 = vadd.f32 %v1347_v52, %v1139_v21  ;;  %v1140_v6 = vmul.f32 %v1827_v47, %v2970_v35  ;;  %v1320_v20 = vadd.f32 %v1282_v9, %v1176_v58  ;;  %v1381_v12 = vadd.f32 %v1317_v60, %v1109_v48 }
 0x224   : > { %1453 = vst [vmem:[%s2959_s30 + $0xf8] sm:$0xff] %v1389_v30  ;;  %v1141_v30 = vmul.f32 %v1828_v7, %v2970_v35  ;;  %v1321_v29 = vadd.f32 %v1282_v9, %v1177_v62  ;;  %v1352_v22 = vadd.f32 %v1282_v9, %v1208_v45  ;;  %v1353_v4 = vadd.f32 %v1282_v9, %v1209_v33 }
 0x225   : > { %1484 = vst [vmem:[%s2959_s30 + $0x1f0] sm:$0xff] %v1420_v49  ;;  %v1829_v49 = vld [vmem:[%s2037_s20 + $0xd0] sm:$0xff]  ;;  %v1412_v39 = vadd.f32 %v1348_v27, %v1140_v6  ;;  %v1322_v19 = vadd.f32 %v1287_v10, %v1178_v3  ;;  %v1323_v42 = vadd.f32 %v1287_v10, %v1179_v32  ;;  %v1115_v46 = vmul.f32 %v1834_v54, %v2984_v57 }
 0x226   : > { %1485 = vst [vmem:[%s2959_s30 + $0x1f8] sm:$0xff] %v1421_v18  ;;  %v1112_v56 = vmul.f32 %v1829_v49, %v2944_v25  ;;  %v1830_v18 = vld [vmem:[%s2037_s20 + $0xd8] sm:$0xff]  ;;  %v1413_v59 = vadd.f32 %v1349_v2, %v1141_v30  ;;  %v1416_v14 = vadd.f32 %v1352_v22, %v1144_v5  ;;  %v1355_v31 = vadd.f32 %v1287_v10, %v1211_v23 }
 0x227   : > { %1438 = vst [vmem:[%s2959_s30 + $0x80] sm:$0xff] %v1374_v41  ;;  %v1113_v35 = vmul.f32 %v1830_v18, %v2944_v25  ;;  %v1417_v25 = vadd.f32 %v1353_v4, %v1145_v43  ;;  %v1386_v52 = vadd.f32 %v1322_v19, %v1114_v15  ;;  %v1387_v37 = vadd.f32 %v1323_v42, %v1115_v46 }
 0x228   : > { %1439 = vst [vmem:[%s2959_s30 + $0x88] sm:$0xff] %v1375_v63  ;;  %v1384_v41 = vadd.f32 %v1320_v20, %v1112_v56  ;;  %v1419_v17 = vadd.f32 %v1355_v31, %v1147_v1 }
 0x229   : > { %1470 = vst [vmem:[%s2959_s30 + $0x180] sm:$0xff] %v1406_v38  ;;  %v1385_v63 = vadd.f32 %v1321_v29, %v1113_v35  ;;  %v1354_v38 = vadd.f32 %v1287_v10, %v1210_v44 }
 0x22a   : > { %1471 = vst [vmem:[%s2959_s30 + $0x188] sm:$0xff] %v1407_v0  ;;  %v1146_v0 = vmul.f32 %v1835_v50, %v2984_v57 }
 0x22b   : > { %1442 = vst [vmem:[%s2959_s30 + $0xa0] sm:$0xff] %v1378_v34 }
 0x22c   : > { %1443 = vst [vmem:[%s2959_s30 + $0xa8] sm:$0xff] %v1379_v16  ;;  %v1418_v34 = vadd.f32 %v1354_v38, %v1146_v0 }
 0x22d   : > { %1474 = vst [vmem:[%s2959_s30 + $0x1a0] sm:$0xff] %v1410_v53 }
 0x22e   : > { %1475 = vst [vmem:[%s2959_s30 + $0x1a8] sm:$0xff] %v1411_v36 }
 0x22f   : > { %1444 = vst [vmem:[%s2959_s30 + $0xb0] sm:$0xff] %v1380_v28 }
 0x230   : > { %1445 = vst [vmem:[%s2959_s30 + $0xb8] sm:$0xff] %v1381_v12 }
 0x231   : > { %1476 = vst [vmem:[%s2959_s30 + $0x1b0] sm:$0xff] %v1412_v39 }
 0x232   : > { %1477 = vst [vmem:[%s2959_s30 + $0x1b8] sm:$0xff] %v1413_v59 }
 0x233   : > { %1448 = vst [vmem:[%s2959_s30 + $0xd0] sm:$0xff] %v1384_v41 }
 0x234   : > { %1449 = vst [vmem:[%s2959_s30 + $0xd8] sm:$0xff] %v1385_v63 }
 0x235   : > { %1480 = vst [vmem:[%s2959_s30 + $0x1d0] sm:$0xff] %v1416_v14 }
 0x236   : > { %1481 = vst [vmem:[%s2959_s30 + $0x1d8] sm:$0xff] %v1417_v25 }
 0x237   : > { %1450 = vst [vmem:[%s2959_s30 + $0xe0] sm:$0xff] %v1386_v52 }
 0x238   : > { %1451 = vst [vmem:[%s2959_s30 + $0xe8] sm:$0xff] %v1387_v37 }
 0x239   : > { %1482 = vst [vmem:[%s2959_s30 + $0x1e0] sm:$0xff] %v1418_v34 }
 0x23a   : > { %1483 = vst [vmem:[%s2959_s30 + $0x1e8] sm:$0xff] %v1419_v17 }
 0x23b   : > { %s1657_s5 = sshll.u32 %s1944_s19, 8  ;;  %s1510_s8 = sshll.u32 %s2959_s30, 4  ;;  %s1511_s8 = int_to_ptr.vmem [resolvable:$true] %s1510_s8 }
 0x23c   : > { %s1499_s29 = scalar_lea.hbm %s3251_s4, %s1657_s5  ;;  %s1892_s25 = smov 4096  }
 0x23d   : > { %s1512_s20 = sshll.u32 %s1499_s29, 4  ;;  %1676 = sst [smem:[#allocation13]] (%p1971_p9), %s1892_s25  ;;  %s1513_s20 = int_to_ptr.hbm [resolvable:$true] %s1512_s20 }
 0x23e   : > { %s1893_s11 = smov 8192   ;;  %s1894_s13 = smov 16  }
 0x23f   : > { %1677 = sst [smem:[#allocation13 + $0x1]] (%p1971_p9), %s1893_s11  ;;  %s1895_s26 = smov 256  }
 0x240   : > { %1678 = sst [smem:[#allocation13 + $0x2]] (%p1971_p9), %s1894_s13  ;;  %s1896_s19 = smov [#allocation12]  }
 0x241   : > { %1679 = sst [smem:[#allocation13 + $0x3]] (%p1971_p9), %s1895_s26  ;;  %s1897_s23 = smov 0  }
 0x242   : > { %1680 = sst [smem:[#allocation13 + $0x4]] (%p1971_p9), %s1895_s26 }
 0x243   : > { %1681 = sst [smem:[#allocation13 + $0x5]] (%p1971_p9), %s1894_s13 }
 0x244   : > { %1682 = dma.general (%p1971_p9), %s1511_s8, 8192, %s1513_s20, %s1487_s0, %s1896_s19, [#allocation13], %s1897_s23, 0  }
 0x245 PF: > { %s1540_s22 = sand.u32 1, %s1867_s15   ;;  %p1685_p1 = pnand %p1628_p11, %p1975_p10 }
 0x246   : > { %s1541_s6 = scalar_lea.sflag [#allocation4], %s1540_s22 }
 0x247   : > { %p1686_p2 = pneg %p1685_p1 }
 0x249   : > { %1862 = dma.done.wait (%p1686_p2), %s1541_s6, 8192  }
 0x24a   : > { %1864 = vsyncadd (%p1686_p2), %s1541_s6, 4294959104  ;;  %p20_p3 = scmp.ge.s32.totalorder %s1948_s21, 4   ;;  %s3292_s15 = smov %s1871_s16 }
 0x24b   : > { %s3293_s16 = smov %s1875_s17  ;;  %s3294_s17 = smov %s1960_s24 }
 0x24c   : > { %s3295_s18 = smov %s1948_s21  ;;  %22 = sbr.rel (!%p20_p3) target bundleno = 9 (0x9), region = 111 }
 0x251   :  { %1547 = vsyncpa [#allocation3], 1 }
 0x252   :  { %1549 = vsyncpa [#allocation3 + $0x1], 1 }
 0x253   :  { %1550 = vsyncpa [#allocation6], 1 }
 0x254   :  { %1552 = vsyncpa [#allocation6 + $0x1], 1 }
 0x255   :  { %1553 = vsyncpa [#allocation4], 1 }
 0x256   :  { %1555 = vsyncpa [#allocation4 + $0x1], 1 }

</bundles_post_ra>
